<compile_context>
chip_gen: v5e
topology: v5e:2x2
jax: 0.10.0
libtpu: 0.0.40
codegen_flags: <defaults>
</compile_context>

<pallas_src>
import functools

import jax
import jax.numpy as jnp
from jax.experimental import pallas as pl
from jax.experimental.pallas import tpu as pltpu


def _content_sa_flash_kernel(x_q_ref, gh_ref, wq_ref, bq_ref, wo_ref, bo_ref,
                             kmask_ref, out_ref,
                             f_scr, m_scr, l_scr, acc_scr,
                             *, mxu_dtype, exp_dtype, approx_recip):
    """Grid = (batch, q-tile, kv-tile); kv-tile is the innermost reduction axis.

    Channels-major layout: activation blocks are (C, T) with spatial positions
    on lanes (lane-dense, unmasked stores).
    """
    ki = pl.program_id(2)
    nk = pl.num_programs(2)
    C = x_q_ref.shape[1]

    # ---- per-(b, q-tile) prologue: query projection + online-softmax state ----
    @pl.when(ki == 0)
    def _init():
        x_q = x_q_ref[0].astype(mxu_dtype)                         # (C, TQ)
        # instance norm already folded into (wq, bq):  f = Wf' @ x + bf'
        f_q = jnp.dot(wq_ref[0], x_q,
                      preferred_element_type=jnp.float32) + bq_ref[0]
        f_scr[...] = f_q.astype(mxu_dtype)                         # (C, TQ)
        m_scr[...] = jnp.full_like(m_scr, -jnp.inf)                # (1, TQ)
        l_scr[...] = jnp.zeros_like(l_scr)                         # (1, TQ)
        acc_scr[...] = jnp.zeros_like(acc_scr)                     # (C, TQ)

    # ---- kv tile: g/h projections precomputed in the wrapper (bf16 stream) ----
    gh = gh_ref[0]                                                 # (2C, TK)
    g_k = gh[:C]                                                   # (C, TK)
    h_k = gh[C:]                                                   # (C, TK)

    # ---- energy^T tile: contract over C directly (no g.T materialization) ----
    # e_t[j, i] = sum_c g[c, j] * f[c, i]   -> (TK, TQ), f32 accumulation
    e_t = jax.lax.dot_general(g_k, f_scr[...], (((0,), (0,)), ((), ())),
                              preferred_element_type=jnp.float32)
    e_t = e_t + kmask_ref[...]                                     # mask padded keys

    # ---- online softmax over the kv axis (sublane axis of e_t) ----
    m_prev = m_scr[...]                                            # (1, TQ)
    m_new = jnp.maximum(m_prev, jnp.max(e_t, axis=0, keepdims=True))
    alpha = jnp.exp(m_prev - m_new)                                # (1, TQ) f32
    # exp in bf16 (EUP bf16 path on v6e/v7x); set exp_dtype=f32 for v5e.
    p = jnp.exp((e_t - m_new).astype(exp_dtype))                   # (TK, TQ)
    l_scr[...] = alpha * l_scr[...] + jnp.sum(p, axis=0, keepdims=True,
                                              dtype=jnp.float32)
    acc_scr[...] = alpha * acc_scr[...] + jnp.dot(
        h_k, p.astype(mxu_dtype), preferred_element_type=jnp.float32)  # (C, TQ)
    m_scr[...] = m_new

    # ---- epilogue: deferred normalization, out_conv, residual ----
    @pl.when(ki == nk - 1)
    def _finalize():
        if approx_recip:
            inv_l = pl.reciprocal(l_scr[...], approx=True)         # (1, TQ)
        else:
            inv_l = 1.0 / l_scr[...]
        out_attn = (acc_scr[...] * inv_l).astype(mxu_dtype)        # (C, TQ)
        out = jnp.dot(wo_ref[...], out_attn,
                      preferred_element_type=jnp.float32) + bo_ref[...]
        out_ref[0] = (out + x_q_ref[0]).astype(out_ref.dtype)


def _pick_tile(n, target, gran):
    """Largest multiple of `gran` that divides n and is <= target; 0 if none."""
    t = (min(target, n) // gran) * gran
    while t >= gran:
        if n % t == 0:
            return t
        t -= gran
    return 0


def _choose_tiles(n, batch, block_q, block_k):
    """Pick (tq, tk, n_pad). Prefer 256-granular tiles (v6e/v7x MXU width)."""
    n_pad = n
    tq = tk = 0
    for gran in (256, 128):
        tq = _pick_tile(n, block_q, gran)
        tk = _pick_tile(n, block_k, gran)
        if tq and tk:
            break
    if not (tq and tk):
        # pad N up to a lane-aligned size instead of an untiled (N,N) step
        n_pad = ((n + 127) // 128) * 128
        tq = _pick_tile(n_pad, block_q, 128) or n_pad
        tk = _pick_tile(n_pad, block_k, 128) or n_pad
    # keep >= 2 "parallel" blocks so both v7x TensorCores get work
    while (batch * (n_pad // tq) < 2 and tq > 128 and tq % 2 == 0
           and (tq // 2) % 128 == 0 and n_pad % (tq // 2) == 0):
        tq //= 2
    return tq, tk, n_pad


def content_sa_pallas(x_nchw, params, *, block_q=512, block_k=256,
                      mxu_dtype=jnp.bfloat16, exp_dtype=jnp.bfloat16,
                      approx_recip=True):
    """x_nchw: (B, C, H, W) float32.  Returns (B, C, H, W) float32."""
    B, C, H, W = x_nchw.shape
    N = H * W
    x = x_nchw.reshape(B, C, N).astype(jnp.float32)   # channels-major, free reshape

    # ---- per-(b, c) instance-norm stats: centered two-pass, ddof=1, eps on var ----
    mean = jnp.mean(x, axis=2)                                        # (B, C)
    centered = x - mean[:, :, None]
    var = jnp.sum(centered * centered, axis=2) / max(N - 1, 1) + 1e-5
    invstd = jax.lax.rsqrt(var)                                       # (B, C)
    xn = centered * invstd[:, :, None]                                # (B, C, N)

    def w32(name):
        return jnp.asarray(params[name], jnp.float32)

    wf, bf = w32("wf"), w32("bf")
    wg, bg = w32("wg"), w32("bg")
    wh, bh = w32("wh"), w32("bh")
    wo, bo = w32("wo"), w32("bo")

    # ---- hoisted kv-side projections (one batched XLA matmul, bf16 stream) ----
    g = jnp.einsum("oc,bcn->bon", wg, xn) + bg[None, :, None]         # (B, C, N)
    h = jnp.einsum("oc,bcn->bon", wh, x) + bh[None, :, None]          # (B, C, N)
    gh = jnp.concatenate([g, h], axis=1).astype(mxu_dtype)            # (B, 2C, N)

    # ---- fold instance norm into the query projection (stays in-kernel) ----
    mi = mean * invstd                                                # (B, C)
    wq = (wf[None, :, :] * invstd[:, None, :]).astype(mxu_dtype)      # (B, C, C)
    bq = (bf[None, :] - jnp.einsum("oc,bc->bo", wf, mi))[:, :, None]  # (B, C, 1) f32
    wo_b = wo.astype(mxu_dtype)                                       # (C, C)
    bo_c = bo.reshape(C, 1)                                           # (C, 1) f32

    tq, tk, N_pad = _choose_tiles(N, B, block_q, block_k)
    if N_pad != N:
        pad = N_pad - N
        x_p = jnp.pad(x, ((0, 0), (0, 0), (0, pad)))
        gh = jnp.pad(gh, ((0, 0), (0, 0), (0, pad)))
        kmask = jnp.concatenate(
            [jnp.zeros((N, 1), jnp.float32),
             jnp.full((pad, 1), -1e30, jnp.float32)], axis=0)
    else:
        x_p = x
        kmask = jnp.zeros((N_pad, 1), jnp.float32)

    grid = (B, N_pad // tq, N_pad // tk)

    kernel = functools.partial(_content_sa_flash_kernel,
                               mxu_dtype=mxu_dtype, exp_dtype=exp_dtype,
                               approx_recip=approx_recip)

    out = pl.pallas_call(
        kernel,
        out_shape=jax.ShapeDtypeStruct((B, C, N_pad), jnp.float32),
        grid=grid,
        in_specs=[
            pl.BlockSpec((1, C, tq), lambda b, qi, ki: (b, 0, qi)),      # x (q side, f32)
            pl.BlockSpec((1, 2 * C, tk), lambda b, qi, ki: (b, 0, ki)),  # g|h (bf16)
            pl.BlockSpec((1, C, C), lambda b, qi, ki: (b, 0, 0)),        # wq (bf16)
            pl.BlockSpec((1, C, 1), lambda b, qi, ki: (b, 0, 0)),        # bq (f32)
            pl.BlockSpec((C, C), lambda b, qi, ki: (0, 0)),              # wo (bf16)
            pl.BlockSpec((C, 1), lambda b, qi, ki: (0, 0)),              # bo (f32)
            pl.BlockSpec((tk, 1), lambda b, qi, ki: (ki, 0)),            # key pad mask
        ],
        out_specs=pl.BlockSpec((1, C, tq), lambda b, qi, ki: (b, 0, qi)),
        scratch_shapes=[
            pltpu.VMEM((C, tq), mxu_dtype),      # f (query projection, MXU dtype)
            pltpu.VMEM((1, tq), jnp.float32),    # running max
            pltpu.VMEM((1, tq), jnp.float32),    # running sum
            pltpu.VMEM((C, tq), jnp.float32),    # output accumulator
        ],
        compiler_params=pltpu.CompilerParams(
            # batch & q-tile axes shard across TensorCores; kv axis is the
            # sequential online-softmax reduction.
            dimension_semantics=("parallel", "parallel", "arbitrary"),
            # 48 MiB: headroom on v7x (64 MiB physical), ample on v5e/v6e (128).
            vmem_limit_bytes=48 * 1024 * 1024),
    )(x_p, gh, wq, bq, wo_b, bo_c, kmask)

    return out[:, :, :N].reshape(B, C, H, W)


# ---------------- pure-JAX reference (mirrors the PyTorch forward) -------------
def _reference(x, params):
    B, C, H, W = x.shape
    N = H * W

    def normal(feat):
        flat = feat.reshape(B, C, N)
        mean = flat.mean(axis=2).reshape(B, C, 1, 1)
        var = flat.var(axis=2, ddof=1) + 1e-5            # unbiased, eps on var
        std = jnp.sqrt(var).reshape(B, C, 1, 1)
        return (feat - mean) / std

    def conv1x1(feat, w, b):                             # w: (Cout, Cin)
        return jnp.einsum("oc,bchw->bohw", w, feat) + b.reshape(1, -1, 1, 1)

    nx = normal(x)
    F = conv1x1(nx, params["wf"], params["bf"]).reshape(B, C, N).transpose(0, 2, 1)
    G = conv1x1(nx, params["wg"], params["bg"]).reshape(B, C, N)
    energy = jnp.einsum("bic,bcj->bij", F, G)
    att = jax.nn.softmax(energy, axis=-1)
    Hh = conv1x1(x, params["wh"], params["bh"]).reshape(B, C, N)
    out = jnp.einsum("bcj,bij->bci", Hh, att).reshape(B, C, H, W)
    out = conv1x1(out, params["wo"], params["bo"])
    return out + x


if __name__ == "__main__":
    key = jax.random.PRNGKey(0)
    B, C, H, W = 2, 4, 16, 16
    k = jax.random.split(key, 9)

    x = jax.random.normal(k[0], (B, C, H, W), dtype=jnp.float32)

    # Conv2d(C, C, (1,1)) -> weight (C, C), bias (C,)
    params = {
        "wf": 0.1 * jax.random.normal(k[1], (C, C), dtype=jnp.float32),
        "bf": 0.1 * jax.random.normal(k[2], (C,), dtype=jnp.float32),
        "wg": 0.1 * jax.random.normal(k[3], (C, C), dtype=jnp.float32),
        "bg": 0.1 * jax.random.normal(k[4], (C,), dtype=jnp.float32),
        "wh": 0.1 * jax.random.normal(k[5], (C, C), dtype=jnp.float32),
        "bh": 0.1 * jax.random.normal(k[6], (C,), dtype=jnp.float32),
        "wo": 0.1 * jax.random.normal(k[7], (C, C), dtype=jnp.float32),
        "bo": 0.1 * jax.random.normal(k[8], (C,), dtype=jnp.float32),
    }

    out = jax.block_until_ready(content_sa_pallas(x, params))
    ref = jax.block_until_ready(_reference(x, params))

    assert out.shape == (B, C, H, W)
    # bf16 MXU operands / bf16 exp (f32 accumulation & softmax state) =>
    # slightly looser tolerance than a pure-f32 path.
    assert jnp.allclose(out, ref, rtol=1e-2, atol=1e-2), "mismatch vs reference"

    print("KERNEL_OK")
</pallas_src>

<mosaic_0001>
module attributes {stable_mosaic.version = 11 : i64} {
  func.func @_content_sa_flash_kernel(%arg0: i32, %arg1: i32, %arg2: i32, %arg3: memref<1x4x256xf32, #tpu.memory_space<vmem>>, %arg4: memref<1x8x256xbf16, #tpu.memory_space<vmem>>, %arg5: memref<1x4x4xbf16, #tpu.memory_space<vmem>>, %arg6: memref<1x4x1xf32, #tpu.memory_space<vmem>>, %arg7: memref<4x4xbf16, #tpu.memory_space<vmem>>, %arg8: memref<4x1xf32, #tpu.memory_space<vmem>>, %arg9: memref<256x1xf32, #tpu.memory_space<vmem>>, %arg10: memref<1x4x256xf32, #tpu.memory_space<vmem>>, %arg11: memref<4x256xbf16, #tpu.memory_space<vmem>>, %arg12: memref<1x256xf32, #tpu.memory_space<vmem>>, %arg13: memref<1x256xf32, #tpu.memory_space<vmem>>, %arg14: memref<4x256xf32, #tpu.memory_space<vmem>>) attributes {dimension_semantics = [#tpu.dimension_semantics<parallel>, #tpu.dimension_semantics<parallel>, #tpu.dimension_semantics<arbitrary>], iteration_bounds = array<i64: 2, 1, 1>, scalar_prefetch = 0 : i64, scratch_operands = 4 : i64, tpu.core_type = #tpu.core_type<tc>, window_params = [{transform_indices = @transform_0, window_bounds = array<i64: 1, 4, 256>}, {transform_indices = @transform_1, window_bounds = array<i64: 1, 8, 256>}, {transform_indices = @transform_2, window_bounds = array<i64: 1, 4, 4>}, {transform_indices = @transform_3, window_bounds = array<i64: 1, 4, 1>}, {pipeline_mode = #tpu.pipeline_mode<synchronous>, transform_indices = @transform_4, window_bounds = array<i64: 4, 4>}, {pipeline_mode = #tpu.pipeline_mode<synchronous>, transform_indices = @transform_5, window_bounds = array<i64: 4, 1>}, {transform_indices = @transform_6, window_bounds = array<i64: 256, 1>}, {transform_indices = @transform_7, window_bounds = array<i64: 1, 4, 256>}]} {
    %c0_i32 = arith.constant 0 : i32
    %0 = arith.cmpi eq, %arg2, %c0_i32 : i32
    %1 = arith.extui %0 : i1 to i32
    %c0_i32_0 = arith.constant 0 : i32
    %2 = arith.cmpi ne, %1, %c0_i32_0 : i32
    scf.if %2 {
      %c0_24 = arith.constant 0 : index
      %c0_25 = arith.constant 0 : index
      %c0_26 = arith.constant 0 : index
      %39 = vector.load %arg3[%c0_24, %c0_25, %c0_26] : memref<1x4x256xf32, #tpu.memory_space<vmem>>, vector<1x4x256xf32>
      %40 = vector.shape_cast %39 : vector<1x4x256xf32> to vector<4x256xf32>
      %41 = arith.truncf %40 : vector<4x256xf32> to vector<4x256xbf16>
      %c0_27 = arith.constant 0 : index
      %c0_28 = arith.constant 0 : index
      %c0_29 = arith.constant 0 : index
      %42 = vector.load %arg5[%c0_27, %c0_28, %c0_29] : memref<1x4x4xbf16, #tpu.memory_space<vmem>>, vector<1x4x4xbf16>
      %43 = vector.shape_cast %42 : vector<1x4x4xbf16> to vector<4x4xbf16>
      %cst_30 = arith.constant dense<0.000000e+00> : vector<4x256xf32>
      %44 = tpu.matmul %43, %41, %cst_30 {dimension_numbers = #tpu.dot_dimension_numbers<[1], [0], [0], [1], [0, 0, 1, 1], [], []>} : vector<4x4xbf16>, vector<4x256xbf16>, vector<4x256xf32> -> vector<4x256xf32>
      %c0_31 = arith.constant 0 : index
      %c0_32 = arith.constant 0 : index
      %c0_33 = arith.constant 0 : index
      %45 = vector.load %arg6[%c0_31, %c0_32, %c0_33] : memref<1x4x1xf32, #tpu.memory_space<vmem>>, vector<1x4x1xf32>
      %46 = vector.shape_cast %45 : vector<1x4x1xf32> to vector<4x1xf32>
      %47 = vector.broadcast %46 : vector<4x1xf32> to vector<4x256xf32>
      %48 = arith.addf %44, %47 : vector<4x256xf32>
      %49 = arith.truncf %48 : vector<4x256xf32> to vector<4x256xbf16>
      %c0_34 = arith.constant 0 : index
      %c0_35 = arith.constant 0 : index
      %50 = vector.load %arg11[%c0_34, %c0_35] : memref<4x256xbf16, #tpu.memory_space<vmem>>, vector<4x256xbf16>
      tpu.vector_store %arg11[%c0_34, %c0_35], %49 {strides = array<i32>} : memref<4x256xbf16, #tpu.memory_space<vmem>>, vector<4x256xbf16>,
      %cst_36 = arith.constant 0xFF800000 : f32
      %51 = vector.broadcast %cst_36 : f32 to vector<1x256xf32>
      %c0_37 = arith.constant 0 : index
      %c0_38 = arith.constant 0 : index
      %52 = vector.load %arg12[%c0_37, %c0_38] : memref<1x256xf32, #tpu.memory_space<vmem>>, vector<1x256xf32>
      tpu.vector_store %arg12[%c0_37, %c0_38], %51 {strides = array<i32>} : memref<1x256xf32, #tpu.memory_space<vmem>>, vector<1x256xf32>,
      %cst_39 = arith.constant 0.000000e+00 : f32
      %53 = vector.broadcast %cst_39 : f32 to vector<1x256xf32>
      %c0_40 = arith.constant 0 : index
      %c0_41 = arith.constant 0 : index
      %54 = vector.load %arg13[%c0_40, %c0_41] : memref<1x256xf32, #tpu.memory_space<vmem>>, vector<1x256xf32>
      tpu.vector_store %arg13[%c0_40, %c0_41], %53 {strides = array<i32>} : memref<1x256xf32, #tpu.memory_space<vmem>>, vector<1x256xf32>,
      %cst_42 = arith.constant 0.000000e+00 : f32
      %55 = vector.broadcast %cst_42 : f32 to vector<4x256xf32>
      %c0_43 = arith.constant 0 : index
      %c0_44 = arith.constant 0 : index
      %56 = vector.load %arg14[%c0_43, %c0_44] : memref<4x256xf32, #tpu.memory_space<vmem>>, vector<4x256xf32>
      tpu.vector_store %arg14[%c0_43, %c0_44], %55 {strides = array<i32>} : memref<4x256xf32, #tpu.memory_space<vmem>>, vector<4x256xf32>,
    } else {
    }
    %c0 = arith.constant 0 : index
    %c0_1 = arith.constant 0 : index
    %c0_2 = arith.constant 0 : index
    %3 = vector.load %arg4[%c0, %c0_1, %c0_2] : memref<1x8x256xbf16, #tpu.memory_space<vmem>>, vector<1x8x256xbf16>
    %4 = vector.shape_cast %3 : vector<1x8x256xbf16> to vector<8x256xbf16>
    %5 = vector.extract_strided_slice %4 {offsets = [0, 0], sizes = [4, 256], strides = [1, 1]} : vector<8x256xbf16> to vector<4x256xbf16>
    %6 = vector.extract_strided_slice %4 {offsets = [4, 0], sizes = [4, 256], strides = [1, 1]} : vector<8x256xbf16> to vector<4x256xbf16>
    %c0_3 = arith.constant 0 : index
    %c0_4 = arith.constant 0 : index
    %7 = vector.load %arg11[%c0_3, %c0_4] : memref<4x256xbf16, #tpu.memory_space<vmem>>, vector<4x256xbf16>
    %cst = arith.constant dense<0.000000e+00> : vector<256x256xf32>
    %8 = tpu.matmul %5, %7, %cst {dimension_numbers = #tpu.dot_dimension_numbers<[0], [0], [1], [1], [0, 1, 1, 1], [], []>} : vector<4x256xbf16>, vector<4x256xbf16>, vector<256x256xf32> -> vector<256x256xf32>
    %c0_5 = arith.constant 0 : index
    %c0_6 = arith.constant 0 : index
    %9 = vector.load %arg9[%c0_5, %c0_6] : memref<256x1xf32, #tpu.memory_space<vmem>>, vector<256x1xf32>
    %10 = vector.broadcast %9 : vector<256x1xf32> to vector<256x256xf32>
    %11 = arith.addf %8, %10 : vector<256x256xf32>
    %c0_7 = arith.constant 0 : index
    %c0_8 = arith.constant 0 : index
    %12 = vector.load %arg12[%c0_7, %c0_8] : memref<1x256xf32, #tpu.memory_space<vmem>>, vector<1x256xf32>
    %cst_9 = arith.constant dense<0xFF800000> : vector<256xf32>
    %13 = vector.multi_reduction <maximumf>, %11, %cst_9 [0] : vector<256x256xf32> to vector<256xf32>
    %14 = vector.shape_cast %13 : vector<256xf32> to vector<1x256xf32>
    %15 = arith.maximumf %12, %14 : vector<1x256xf32>
    %16 = arith.subf %12, %15 : vector<1x256xf32>
    %17 = math.exp %16 : vector<1x256xf32>
    %18 = vector.broadcast %15 : vector<1x256xf32> to vector<256x256xf32>
    %19 = arith.subf %11, %18 : vector<256x256xf32>
    %20 = arith.truncf %19 : vector<256x256xf32> to vector<256x256xbf16>
    %21 = math.exp %20 : vector<256x256xbf16>
    %c0_10 = arith.constant 0 : index
    %c0_11 = arith.constant 0 : index
    %22 = vector.load %arg13[%c0_10, %c0_11] : memref<1x256xf32, #tpu.memory_space<vmem>>, vector<1x256xf32>
    %23 = arith.mulf %17, %22 : vector<1x256xf32>
    %24 = arith.extf %21 : vector<256x256xbf16> to vector<256x256xf32>
    %cst_12 = arith.constant dense<0.000000e+00> : vector<256xf32>
    %25 = vector.multi_reduction <add>, %24, %cst_12 [0] : vector<256x256xf32> to vector<256xf32>
    %26 = vector.shape_cast %25 : vector<256xf32> to vector<1x256xf32>
    %27 = arith.addf %23, %26 : vector<1x256xf32>
    %c0_13 = arith.constant 0 : index
    %c0_14 = arith.constant 0 : index
    %28 = vector.load %arg13[%c0_13, %c0_14] : memref<1x256xf32, #tpu.memory_space<vmem>>, vector<1x256xf32>
    tpu.vector_store %arg13[%c0_13, %c0_14], %27 {strides = array<i32>} : memref<1x256xf32, #tpu.memory_space<vmem>>, vector<1x256xf32>,
    %c0_15 = arith.constant 0 : index
    %c0_16 = arith.constant 0 : index
    %29 = vector.load %arg14[%c0_15, %c0_16] : memref<4x256xf32, #tpu.memory_space<vmem>>, vector<4x256xf32>
    %30 = vector.broadcast %17 : vector<1x256xf32> to vector<4x256xf32>
    %31 = arith.mulf %30, %29 : vector<4x256xf32>
    %cst_17 = arith.constant dense<0.000000e+00> : vector<4x256xf32>
    %32 = tpu.matmul %6, %21, %cst_17 {dimension_numbers = #tpu.dot_dimension_numbers<[1], [0], [0], [1], [0, 0, 1, 1], [], []>} : vector<4x256xbf16>, vector<256x256xbf16>, vector<4x256xf32> -> vector<4x256xf32>
    %33 = arith.addf %31, %32 : vector<4x256xf32>
    %c0_18 = arith.constant 0 : index
    %c0_19 = arith.constant 0 : index
    %34 = vector.load %arg14[%c0_18, %c0_19] : memref<4x256xf32, #tpu.memory_space<vmem>>, vector<4x256xf32>
    tpu.vector_store %arg14[%c0_18, %c0_19], %33 {strides = array<i32>} : memref<4x256xf32, #tpu.memory_space<vmem>>, vector<4x256xf32>,
    %c0_20 = arith.constant 0 : index
    %c0_21 = arith.constant 0 : index
    %35 = vector.load %arg12[%c0_20, %c0_21] : memref<1x256xf32, #tpu.memory_space<vmem>>, vector<1x256xf32>
    tpu.vector_store %arg12[%c0_20, %c0_21], %15 {strides = array<i32>} : memref<1x256xf32, #tpu.memory_space<vmem>>, vector<1x256xf32>,
    %c0_i32_22 = arith.constant 0 : i32
    %36 = arith.cmpi eq, %arg2, %c0_i32_22 : i32
    %37 = arith.extui %36 : i1 to i32
    %c0_i32_23 = arith.constant 0 : i32
    %38 = arith.cmpi ne, %37, %c0_i32_23 : i32
    scf.if %38 {
      %c0_24 = arith.constant 0 : index
      %c0_25 = arith.constant 0 : index
      %39 = vector.load %arg13[%c0_24, %c0_25] : memref<1x256xf32, #tpu.memory_space<vmem>>, vector<1x256xf32>
      %40 = tpu.reciprocal %39 {approx = true} : vector<1x256xf32> -> vector<1x256xf32>
      %c0_26 = arith.constant 0 : index
      %c0_27 = arith.constant 0 : index
      %41 = vector.load %arg14[%c0_26, %c0_27] : memref<4x256xf32, #tpu.memory_space<vmem>>, vector<4x256xf32>
      %42 = vector.broadcast %40 : vector<1x256xf32> to vector<4x256xf32>
      %43 = arith.mulf %41, %42 : vector<4x256xf32>
      %44 = arith.truncf %43 : vector<4x256xf32> to vector<4x256xbf16>
      %c0_28 = arith.constant 0 : index
      %c0_29 = arith.constant 0 : index
      %45 = vector.load %arg7[%c0_28, %c0_29] : memref<4x4xbf16, #tpu.memory_space<vmem>>, vector<4x4xbf16>
      %cst_30 = arith.constant dense<0.000000e+00> : vector<4x256xf32>
      %46 = tpu.matmul %45, %44, %cst_30 {dimension_numbers = #tpu.dot_dimension_numbers<[1], [0], [0], [1], [0, 0, 1, 1], [], []>} : vector<4x4xbf16>, vector<4x256xbf16>, vector<4x256xf32> -> vector<4x256xf32>
      %c0_31 = arith.constant 0 : index
      %c0_32 = arith.constant 0 : index
      %47 = vector.load %arg8[%c0_31, %c0_32] : memref<4x1xf32, #tpu.memory_space<vmem>>, vector<4x1xf32>
      %48 = vector.broadcast %47 : vector<4x1xf32> to vector<4x256xf32>
      %49 = arith.addf %46, %48 : vector<4x256xf32>
      %c0_33 = arith.constant 0 : index
      %c0_34 = arith.constant 0 : index
      %c0_35 = arith.constant 0 : index
      %50 = vector.load %arg3[%c0_33, %c0_34, %c0_35] : memref<1x4x256xf32, #tpu.memory_space<vmem>>, vector<1x4x256xf32>
      %51 = vector.shape_cast %50 : vector<1x4x256xf32> to vector<4x256xf32>
      %52 = arith.addf %49, %51 : vector<4x256xf32>
      %c0_36 = arith.constant 0 : index
      %c0_37 = arith.constant 0 : index
      %c0_38 = arith.constant 0 : index
      %53 = vector.load %arg10[%c0_36, %c0_37, %c0_38] : memref<1x4x256xf32, #tpu.memory_space<vmem>>, vector<1x4x256xf32>
      %54 = vector.shape_cast %53 : vector<1x4x256xf32> to vector<4x256xf32>
      %55 = vector.shape_cast %52 : vector<4x256xf32> to vector<1x4x256xf32>
      tpu.vector_store %arg10[%c0_36, %c0_37, %c0_38], %55 {strides = array<i32>} : memref<1x4x256xf32, #tpu.memory_space<vmem>>, vector<1x4x256xf32>,
    } else {
    }
    return
  }
  func.func @transform_0(%arg0: i32, %arg1: i32, %arg2: i32) -> (i32, i32, i32) {
    %c0_i32 = arith.constant 0 : i32
    %c0_i32_0 = arith.constant 0 : i32
    return %arg0, %c0_i32, %arg1 : i32, i32, i32
  }
  func.func @transform_1(%arg0: i32, %arg1: i32, %arg2: i32) -> (i32, i32, i32) {
    %c0_i32 = arith.constant 0 : i32
    %c0_i32_0 = arith.constant 0 : i32
    return %arg0, %c0_i32, %arg2 : i32, i32, i32
  }
  func.func @transform_2(%arg0: i32, %arg1: i32, %arg2: i32) -> (i32, i32, i32) {
    %c0_i32 = arith.constant 0 : i32
    %c0_i32_0 = arith.constant 0 : i32
    %c0_i32_1 = arith.constant 0 : i32
    return %arg0, %c0_i32, %c0_i32_0 : i32, i32, i32
  }
  func.func @transform_3(%arg0: i32, %arg1: i32, %arg2: i32) -> (i32, i32, i32) {
    %c0_i32 = arith.constant 0 : i32
    %c0_i32_0 = arith.constant 0 : i32
    %c0_i32_1 = arith.constant 0 : i32
    return %arg0, %c0_i32, %c0_i32_0 : i32, i32, i32
  }
  func.func @transform_4(%arg0: i32, %arg1: i32, %arg2: i32) -> (i32, i32) {
    %c0_i32 = arith.constant 0 : i32
    %c0_i32_0 = arith.constant 0 : i32
    %c0_i32_1 = arith.constant 0 : i32
    return %c0_i32, %c0_i32_0 : i32, i32
  }
  func.func @transform_5(%arg0: i32, %arg1: i32, %arg2: i32) -> (i32, i32) {
    %c0_i32 = arith.constant 0 : i32
    %c0_i32_0 = arith.constant 0 : i32
    %c0_i32_1 = arith.constant 0 : i32
    return %c0_i32, %c0_i32_0 : i32, i32
  }
  func.func @transform_6(%arg0: i32, %arg1: i32, %arg2: i32) -> (i32, i32) {
    %c0_i32 = arith.constant 0 : i32
    %c0_i32_0 = arith.constant 0 : i32
    return %arg2, %c0_i32 : i32, i32
  }
  func.func @transform_7(%arg0: i32, %arg1: i32, %arg2: i32) -> (i32, i32, i32) {
    %c0_i32 = arith.constant 0 : i32
    %c0_i32_0 = arith.constant 0 : i32
    return %arg0, %c0_i32, %arg1 : i32, i32, i32
  }
}

</mosaic_0001>

<bundles_post_ra>
// kernel: tpu_custom_call.1
= control target key start
LH: loop header
LB: loop body
LE: loop exit
PB: predicated region body
PF: predicated region fallthrough
CT: control target
= control target key end

     0   :  { %12 = vsyncpa [#allocation7], 0  ;;  %s3300_s0 = inlined_call_operand.vmem [shape: f32[2,4,256], index: 0, kind: input, shape index: {}]   ;;  %s3301_s1 = inlined_call_operand.vmem [shape: bf16[2,8,256], index: 1, kind: input, shape index: {}]   ;;  %s3302_s2 = inlined_call_operand.vmem [shape: bf16[2,4,4], index: 2, kind: input, shape index: {}]   ;;  %s3303_s3 = inlined_call_operand.vmem [shape: f32[2,4,1], index: 3, kind: input, shape index: {}]   ;;  %s3304_s4 = inlined_call_operand.vmem [shape: bf16[4,4], index: 4, kind: input, shape index: {}]   ;;  %s3305_s5 = inlined_call_operand.vmem [shape: f32[4,1], index: 5, kind: input, shape index: {}]   ;;  %s3306_s6 = inlined_call_operand.vmem [shape: f32[256,1], index: 6, kind: input, shape index: {}]   ;;  %s3307_s7 = inlined_call_operand.hbm [shape: f32[2,4,256], index: 7, kind: output, shape index: {}]  }
   0x1   :  { %14 = vsyncpa [#allocation7 + $0x1], 0  ;;  %s2190_s24 = smov 0   ;;  %s2192_s25 = smov 0  }
   0x2   :  { %s2194_s26 = smov 0   ;;  %s2196_s27 = smov 0  }
   0x3   :  { %s2198_s28 = smov 0   ;;  %s2200_s29 = smov 0  }
   0x4 LB: > { %s1815_s30 = sadd.s32 4294967295, %s2145_s29   ;;  %s1816_s8 = sadd.s32 4294967294, %s2145_s29   ;;  %s2145_s29 = sphi %s2200_s29, %s20_s29   ;;  %s2141_s28 = sphi %s2198_s28, %s3474_s28   ;;  %s2137_s27 = sphi %s2196_s27, %s3473_s27   ;;  %s2133_s26 = sphi %s2194_s26, %s3472_s26   ;;  %s2129_s25 = sphi %s2192_s25, %s3471_s25   ;;  %s2125_s24 = sphi %s2190_s24, %s3470_s24  }
   0x5   : > { %s39_s9 = sadd.s32 1, %s2141_s28  ;;  %s224_s10 = sadd.s32 1, %s2133_s26 }
   0x6   : > { %p41_p0 = scmp.ge.s32.totalorder %s39_s9, 2  ;;  %p234_p1 = scmp.ne.s32.totalorder %s2133_s26, %s2129_s25 }
   0x7   : > { %p235_p2 = scmp.eq.s32.totalorder %s1815_s30, 1  ;;  %p240_p3 = scmp.ne.s32.totalorder %s2129_s25, %s2125_s24 }
   0x8   : > { %s3476_s9 = smov (%p41_p0, %s39_s9), 0  ;;  %p241_p5 = scmp.eq.s32.totalorder %s1816_s8, 1 }
   0x9   : > { %p2230_p4 = por %p235_p2, %p234_p1  ;;  %s219_s12 = ssub.s32 %s2141_s28, %s3476_s9 }
   0xa   : > { %p1820_p6 = scmp.ge.s32.totalorder %s2145_s29, 1  ;;  %p222_p7 = scmp.eq.s32.totalorder %s219_s12, 0 }
   0xb   : > { %p2237_p8 = por %p241_p5, %p240_p3  ;;  %p314_p9 = scmp.lt.s32.totalorder %s2145_s29, 3 }
   0xc   : > { %s2243_s14 = scalar_select %p222_p7, %s2133_s26, %s224_s10  }
   0xd   : > { %p315_p10 = pnand %p1820_p6, %p314_p9 }
   0xf   : > { %318 = sbr.rel (%p315_p10) target bundleno = 1060 (0x424), region = 48 }
  0x14   : > { %p373_p11 = scmp.lt.s32.totalorder %s2137_s27, 1  ;;  %v2147_v0 = vmov 0   ;;  %vm432_vm0 = vcmask 1041408   ;;  %vm428_vm1 = vcmask 31744   ;;  %v3308_v30 = vmov 0.0   ;;  %v482_v31 = vld [vmem:[%s3306_s6] sm:$0xff] }
  0x15   : > { %1932 = vset.pattern.permute.xlu0 %v2147_v0  ;;  %1933 = vset.pattern.permute.xlu1 %v2147_v0  ;;  %v483_v32 = vld [vmem:[%s3306_s6 + $0x8] sm:$0xff]  ;;  %v486_v35 = vld [vmem:[%s3306_s6 + $0x20] sm:$0xff]  ;;  %v488_v37 = vld [vmem:[%s3306_s6 + $0x30] sm:$0xff]  ;;  %vm1019_vm3 = vcmask 1040384   ;;  %vm1577_vm4 = vcmask 1043456   ;;  %s369_s21 = sand.u32 1, %s2129_s25  }
  0x16   : > { %s374_s15 = scalar_select %p373_p11, %s2137_s27, 1  ;;  %1934 = vset.pattern.permute.xlu2 %v2147_v0  ;;  %516 = vperm.xlu1 %1933, %v482_v31   ;;  %v484_v38 = vld [vmem:[%s3306_s6 + $0x10] sm:$0xff]  ;;  %v490_v40 = vld [vmem:[%s3306_s6 + $0x40] sm:$0xff]  ;;  %v485_v41 = vld [vmem:[%s3306_s6 + $0x18] sm:$0xff] }
  0x17   : > { %526 = vperm.xlu2 %1934, %v484_v38   ;;  %v492_v43 = vld [vmem:[%s3306_s6 + $0x50] sm:$0xff]  ;;  %v487_v45 = vld [vmem:[%s3306_s6 + $0x28] sm:$0xff]  ;;  %v494_v47 = vld [vmem:[%s3306_s6 + $0x60] sm:$0xff]  ;;  %s1821_s22 = sshll.u32 %s369_s21, 3 }
  0x18   : > { %s1827_s16 = sshll.u32 %s374_s15, 2  ;;  %s1869_s17 = sshll.u32 %s374_s15, 3  ;;  %v495_v46 = vld [vmem:[%s3306_s6 + $0x68] sm:$0xff]  ;;  %v489_v49 = vld [vmem:[%s3306_s6 + $0x38] sm:$0xff]  ;;  %v496_v58 = vld [vmem:[%s3306_s6 + $0x70] sm:$0xff] }
  0x19   : > { %s399_s20 = scalar_lea.vmem %s3303_s3, %s1827_s16  ;;  %s380_s23 = scalar_lea.vmem %s3300_s0, %s1869_s17  ;;  %v497_v50 = vld [vmem:[%s3306_s6 + $0x78] sm:$0xff]  ;;  %v491_v52 = vld [vmem:[%s3306_s6 + $0x48] sm:$0xff]  ;;  %v498_v61 = vld [vmem:[%s3306_s6 + $0x80] sm:$0xff] }
  0x1a   : > { %v422_v1 = vld [vmem:[%s399_s20] sm:$0xf]  ;;  %s1826_s30 = sshll.u32 %s374_s15, 1  ;;  %s390_s18 = scalar_lea.vmem %s3301_s1, %s1869_s17  ;;  %v499_v53 = vld [vmem:[%s3306_s6 + $0x88] sm:$0xff]  ;;  %v493_v55 = vld [vmem:[%s3306_s6 + $0x58] sm:$0xff] }
  0x1b   : > { %v2253_v2 = vld [vmem:[%s380_s23] sm:$0xff]  ;;  %425 = vperm.xlu0 %1932, %v422_v1   ;;  %s395_s12 = scalar_lea.vmem %s3302_s2, %s1826_s30  ;;  %v501_v56 = vld [vmem:[%s3306_s6 + $0x98] sm:$0xff]  ;;  %v503_v59 = vld [vmem:[%s3306_s6 + $0xa8] sm:$0xff]  ;;  %s1871_s23 = sshll.u32 %s2137_s27, 3 }
  0x1c   : > { %3352 = vst [vmem:[#allocation9_spill] sm:$0xff] %v2253_v2  ;;  %v421_v9 = vld [vmem:[%s395_s12] sm:$0x3]  ;;  %v505_v62 = vld [vmem:[%s3306_s6 + $0xb8] sm:$0xff]  ;;  %v500_v63 = vld [vmem:[%s3306_s6 + $0x90] sm:$0xff]  ;;  %s1674_s10 = scalar_lea.hbm %s3307_s7, %s1871_s23  ;;  %s371_s12 = scalar_lea.vmem [#allocation6], %s1821_s22 }
  0x1d   : > { %414 = vst [vmem:[#allocation1] ss:$2 sm:$0xff] %v2253_v2  ;;  %v480_v10 = vld [vmem:[%s390_s18] sm:$0xff]  ;;  %v507_v1 = vld [vmem:[%s3306_s6 + $0xc8] sm:$0xff]  ;;  %s1676_s15 = sshll.u32 %s371_s12, 4  ;;  %s1678_s16 = sshll.u32 %s1674_s10, 4  ;;  %s1677_s15 = int_to_ptr.vmem [resolvable:$true] %s1676_s15  ;;  %s1679_s16 = int_to_ptr.hbm [resolvable:$true] %s1678_s16 }
  0x1e   : > { %v675_v11 = vunpack.c.l.b16 %v480_v10  ;;  %v676_v12 = vunpack.c.h.b16 %v480_v10  ;;  %521 = vperm.xlu1 %1933, %v483_v32   ;;  %v506_v10 = vld [vmem:[%s3306_s6 + $0xc0] sm:$0xff]  ;;  %s1661_s27 = scalar_lea.sflag [#allocation7], %s369_s21  ;;  %s2081_s18 = sshra.s32 %s1679_s16, 4  ;;  %s2082_s18 = int_to_ptr.hbm [resolvable:$true] %s2081_s18 }
  0x1f   : > { %531 = vperm.xlu2 %1934, %v485_v41   ;;  %s2083_s17 = scalar_lea.hbm %s2082_s18, 8  ;;  %s2087_s22 = scalar_lea.hbm %s3307_s7, 16 }
  0x20   : > { %v2266_v13 = vpack.c.b16 %v675_v11, %v675_v11  ;;  %v2268_v14 = vpack.c.b16 %v676_v12, %v676_v12  ;;  %v513_v11 = vld [vmem:[%s3306_s6 + $0xf8] sm:$0xff]  ;;  %v508_v12 = vld [vmem:[%s3306_s6 + $0xd0] sm:$0xff]  ;;  %p2084_p12 = scmp.ne.s32.totalorder %s2082_s18, %s2083_s17  ;;  %p2088_p1 = scmp.lt.s32.totalorder %s2082_s18, %s3307_s7 }
  0x21   : > { %p2089_p2 = scmp.lt.s32.totalorder %s2087_s22, %s2083_s17 }
  0x22   : > { %3353 = vst [vmem:[#allocation10_spill] sm:$0xff] %v2266_v13  ;;  %p2085_p13 = pnand %p2084_p12, %p2230_p4 }
  0x23   : > { %3354 = vst [vmem:[#allocation11_spill] sm:$0xff] %v2268_v14  ;;  %p2090_p3 = por %p2089_p2, %p2088_p1 }
  0x24   : > { %v415_v3 = vld.sshfl [vmem:[#allocation1] sm:$0xff pattern:$0x75316420]  ;;  %v416_v4 = vld.sshfl [vmem:[#allocation1 + $0x8] sm:$0xff pattern:$0x75316420]  ;;  %p2086_p0 = pneg %p2085_p13 }
  0x25   : > { %v419_v5 = vpack.c.bf16 %v415_v3, %v415_v3  ;;  %v420_v6 = vpack.c.bf16 %v416_v4, %v416_v4  ;;  %v502_v4 = vld [vmem:[%s3306_s6 + $0xa0] sm:$0xff] }
  0x26   : > { %536 = vperm.xlu1 %1933, %v486_v35   ;;  %p2091_p5 = pnand %p2090_p3, %p2086_p0 }
  0x27   : > { %v434_v7 = vsel %vm432_vm0, %v419_v5, 0  ;;  %v437_v8 = vsel %vm432_vm0, %v420_v6, 0  ;;  %541 = vperm.xlu2 %1934, %v487_v45   ;;  %v509_v5 = vld [vmem:[%s3306_s6 + $0xd8] sm:$0xff]  ;;  %v504_v6 = vld [vmem:[%s3306_s6 + $0xb0] sm:$0xff] }
  0x28   : > { %446 = vmatpush.bf16.msra.mxu0 %v434_v7  ;;  %459 = vmatpush.bf16.msra.mxu1 %v437_v8  ;;  %v511_v8 = vld [vmem:[%s3306_s6 + $0xe8] sm:$0xff] }
  0x2b   : > { %1828 = vmatmul.msk.bf16.vlgmr.msra.gmra.mxu0 %vm428_vm1, %v421_v9  ;;  %1829 = vmatmul.msk.bf16.vlgmr.msra.gmra.mxu1 %vm428_vm1, %v421_v9 }
  0x2e   : > { %546 = vperm.xlu1 %1933, %v488_v37  }
  0x2f   : > { %551 = vperm.xlu2 %1934, %v489_v49  }
  0x36   : > { %556 = vperm.xlu1 %1933, %v490_v40  }
  0x37   : > { %561 = vperm.xlu2 %1934, %v491_v52  }
  0x3d   : > { %681 = vxpose.binary.xlu0.c.b16.start.end [1/2] (short) %v2268_v14, %v2266_v13, 128 }
  0x3e   : > { %566 = vperm.xlu1 %1933, %v492_v43  }
  0x3f   : > { %571 = vperm.xlu2 %1934, %v493_v55  }
  0x46   : > { %581 = vperm.xlu1 %1933, %v495_v46  }
  0x47   : > { %586 = vperm.xlu2 %1934, %v496_v58  }
  0x4e   : > { %591 = vperm.xlu1 %1933, %v497_v50  }
  0x4f   : > { %596 = vperm.xlu2 %1934, %v498_v61  }
  0x56   : > { %601 = vperm.xlu1 %1933, %v499_v53  }
  0x57   : > { %606 = vperm.xlu2 %1934, %v500_v63  }
  0x5e   : > { %611 = vperm.xlu1 %1933, %v501_v56  }
  0x5f   : > { %616 = vperm.xlu2 %1934, %v502_v4  }
  0x66   : > { %621 = vperm.xlu1 %1933, %v503_v59  }
  0x67   : > { %626 = vperm.xlu2 %1934, %v504_v6  }
  0x6e   : > { %631 = vperm.xlu1 %1933, %v505_v62  }
  0x6f   : > { %636 = vperm.xlu2 %1934, %v506_v10  }
  0x71   : > { %v2441_v32 = vpop.permute.xlu2 %526 }
  0x76   : > { %641 = vperm.xlu1 %1933, %v507_v1  }
  0x77   : > { %646 = vperm.xlu2 %1934, %v508_v12  }
  0x79   : > { %v2451_v37 = vpop.permute.xlu2 %531 }
  0x7e   : > { %651 = vperm.xlu1 %1933, %v509_v5  }
  0x81   : > { %v2459_v41 = vpop.permute.xlu2 %541 }
  0x86   : > { %661 = vperm.xlu1 %1933, %v511_v8  }
  0x89   : > { %v2467_v45 = vpop.permute.xlu2 %551 }
  0x8d   : > { %v426_v15 = vpop.permute.xlu0 %425 }
  0x8e   : > { %671 = vperm.xlu1 %1933, %v513_v11  }
  0x91   : > { %v2479_v53 = vpop.permute.xlu2 %561 }
  0x99   : > { %v2487_v59 = vpop.permute.xlu2 %571 }
  0xa1   : > { %v2495_v1 = vpop.permute.xlu2 %586 }
  0xa8   : > { %v448_v16 = vpop.f32.mrf.mxu0  ;;  %v461_v17 = vpop.f32.mrf.mxu1 }
  0xa9   : > { %v449_v18 = vadd.f32 %v448_v16, %v426_v15  ;;  %v462_v19 = vadd.f32 %v461_v17, %v426_v15  ;;  %v517_v15 = vpop.permute.xlu1 %516  ;;  %v2503_v8 = vpop.permute.xlu2 %596 }
  0xab   : > { %v465_v20 = vpack.c.bf16 %v462_v19, %v449_v18 }
  0xad   : > { %v467_v21 = vrot.slane %v465_v20, 2 }
  0xaf   : > { %v470_v22 = vsel %vm432_vm0, %v465_v20, %v467_v21  ;;  %v510_v20 = vld [vmem:[%s3306_s6 + $0xe0] sm:$0xff]  ;;  %v512_v21 = vld [vmem:[%s3306_s6 + $0xf0] sm:$0xff] }
  0xb0   : > { %472 = vst [vmem:[#allocation2] sm:$0xf] %v470_v22  ;;  %v450_v23 = vpop.f32.mrf.mxu0  ;;  %v463_v24 = vpop.f32.mrf.mxu1  ;;  %656 = vperm.xlu2 %1934, %v510_v20   ;;  %v1604_v22 = vld [vmem:[%s3305_s5] sm:$0xf] }
  0xb1   : > { %v2515_v20 = vpop.permute.xlu2 %606 }
  0xb7   : > { %v481_v25 = vld [vmem:[#allocation2] sm:$0xf] }
  0xb8   : > { %706 = vst [vmem:[#allocation1] ss:$4 sm:$0xff] %v481_v25  ;;  %666 = vperm.xlu2 %1934, %v512_v21  }
  0xb9   : > { %v2523_v14 = vpop.permute.xlu2 %616 }
  0xba   : > { %3366 = vst [vmem:[#allocation23_spill] sm:$0xff] %v2523_v14 }
  0xbf   : > { %v707_v26 = vld.sshfl [vmem:[#allocation1] sm:$0xff pattern:$0x73625140]  ;;  %v708_v27 = vld.sshfl [vmem:[#allocation1 + $0x8] sm:$0xff pattern:$0x73625140] }
  0xc0   : > { %v759_v28 = vsel %vm432_vm0, %v707_v26, 0  ;;  %v761_v29 = vsel %vm432_vm0, %v708_v27, 0  ;;  %1509 = vst [vmem:[#allocation1] ss:$2 sm:$0xff] %v3308_v30  ;;  %1607 = vperm.xlu2 %1934, %v1604_v22  }
  0xc1   : > { %770 = vmatpush.bf16.msrb.mxu0 %v759_v28  ;;  %1872 = vmatpush.bf16.msra.mxu2 %v759_v28 }
  0xc2   : > { %859 = vmatpush.bf16.msrb.mxu1 %v761_v29  ;;  %1873 = vmatpush.bf16.msra.mxu3 %v761_v29 }
  0xe9   : > { %v689_v33 = vpop.trf.xlu0 }
  0xea   : > { %1830 = vmatmul.msk.bf16.vlgmr.msrb.gmra.mxu0 %vm428_vm1, %v689_v33  ;;  %1846 = vmatmul.msk.bf16.vlgmr.msrb.gmra.mxu1 %vm428_vm1, %v689_v33 }
  0xf1   : > { %v2284_v34 = vpop.trf.xlu0 }
  0xf9   : > { %v691_v36 = vpop.trf.xlu0 }
  0xfa   : > { %1831 = vmatmul.msk.bf16.gmra.mxu0 %vm428_vm1, %v691_v36  ;;  %1847 = vmatmul.msk.bf16.gmra.mxu1 %vm428_vm1, %v691_v36 }
 0x101   : > { %v2297_v39 = vpop.trf.xlu0 }
 0x109   : > { %v693_v42 = vpop.trf.xlu0 }
 0x10a   : > { %1832 = vmatmul.msk.bf16.gmra.mxu0 %vm428_vm1, %v693_v42  ;;  %1848 = vmatmul.msk.bf16.gmra.mxu1 %vm428_vm1, %v693_v42 }
 0x111   : > { %v2310_v44 = vpop.trf.xlu0 }
 0x119   : > { %v695_v48 = vpop.trf.xlu0 }
 0x11a   : > { %1833 = vmatmul.msk.bf16.gmra.mxu0 %vm428_vm1, %v695_v48  ;;  %1849 = vmatmul.msk.bf16.gmra.mxu1 %vm428_vm1, %v695_v48 }
 0x11b   : > { %576 = vperm.xlu0 %1932, %v494_v47  }
 0x121   : > { %v2329_v51 = vpop.trf.xlu0 }
 0x129   : > { %v697_v54 = vpop.trf.xlu0 }
 0x12a   : > { %1834 = vmatmul.msk.bf16.gmra.mxu0 %vm428_vm1, %v697_v54  ;;  %1850 = vmatmul.msk.bf16.gmra.mxu1 %vm428_vm1, %v697_v54 }
 0x131   : > { %v698_v57 = vpop.trf.xlu0 }
 0x139   : > { %v699_v60 = vpop.trf.xlu0 }
 0x13a   : > { %1835 = vmatmul.msk.bf16.vlgmr.msra.gmra.mxu2 %vm428_vm1, %v699_v60  ;;  %1851 = vmatmul.msk.bf16.vlgmr.msra.gmra.mxu3 %vm428_vm1, %v699_v60 }
 0x141   : > { %v700_v0 = vpop.trf.xlu0 }
 0x149   : > { %v701_v3 = vpop.trf.xlu0 }
 0x14a   : > { %1836 = vmatmul.msk.bf16.gmra.mxu2 %vm428_vm1, %v701_v3  ;;  %1852 = vmatmul.msk.bf16.gmra.mxu3 %vm428_vm1, %v701_v3 }
 0x151   : > { %v702_v7 = vpop.trf.xlu0 }
 0x159   : > { %v703_v9 = vpop.trf.xlu0 }
 0x15a   : > { %1837 = vmatmul.msk.bf16.gmra.mxu2 %vm428_vm1, %v703_v9  ;;  %1853 = vmatmul.msk.bf16.gmra.mxu3 %vm428_vm1, %v703_v9 }
 0x161   : > { %v704_v33 = vpop.trf.xlu0 }
 0x167   : > { %v772_v16 = vpop.f32.mrf.mxu0  ;;  %v861_v17 = vpop.f32.mrf.mxu1 }
 0x168   : > { %v2390_v18 = vadd.f32 %v772_v16, %v517_v15  ;;  %v2392_v19 = vadd.f32 %v861_v17, %v517_v15 }
 0x16a   : > { %1838 = vmatmul.msk.bf16.gmra.mxu2 %vm428_vm1, %v2284_v34  ;;  %1854 = vmatmul.msk.bf16.gmra.mxu3 %vm428_vm1, %v2284_v34  ;;  %v2443_v34 = vpop.permute.xlu1 %521 }
 0x16f   : > { %v774_v49 = vpop.f32.mrf.mxu0  ;;  %v863_v50 = vpop.f32.mrf.mxu1 }
 0x172   : > { %v2453_v38 = vpop.permute.xlu1 %536 }
 0x177   : > { %v777_v55 = vpop.f32.mrf.mxu0  ;;  %v866_v56 = vpop.f32.mrf.mxu1 }
 0x17a   : > { %1839 = vmatmul.msk.bf16.gmra.mxu2 %vm428_vm1, %v2297_v39  ;;  %1855 = vmatmul.msk.bf16.gmra.mxu3 %vm428_vm1, %v2297_v39  ;;  %v2461_v42 = vpop.permute.xlu1 %546 }
 0x17f   : > { %v779_v61 = vpop.f32.mrf.mxu0 }
 0x182   : > { %v2473_v48 = vpop.permute.xlu1 %556 }
 0x187   : > { %v782_v6 = vpop.f32.mrf.mxu0 }
 0x18a   : > { %1840 = vmatmul.msk.bf16.gmra.mxu2 %vm428_vm1, %v2310_v44  ;;  %1856 = vmatmul.msk.bf16.gmra.mxu3 %vm428_vm1, %v2310_v44  ;;  %v2481_v54 = vpop.permute.xlu1 %566 }
 0x18f   : > { %v784_v12 = vpop.f32.mrf.mxu0 }
 0x192   : > { %v2489_v60 = vpop.permute.xlu1 %581 }
 0x197   : > { %v787_v22 = vpop.f32.mrf.mxu0 }
 0x19a   : > { %1841 = vmatmul.msk.bf16.gmra.mxu2 %vm428_vm1, %v2329_v51  ;;  %1857 = vmatmul.msk.bf16.gmra.mxu3 %vm428_vm1, %v2329_v51  ;;  %v2497_v3 = vpop.permute.xlu1 %591 }
 0x1a2   : > { %v2509_v11 = vpop.permute.xlu1 %601 }
 0x1aa   : > { %1842 = vmatmul.msk.bf16.gmra.mxu2 %vm428_vm1, %v698_v57  ;;  %1858 = vmatmul.msk.bf16.gmra.mxu3 %vm428_vm1, %v698_v57  ;;  %v2517_v21 = vpop.permute.xlu1 %611 }
 0x1b2   : > { %v2525_v13 = vpop.permute.xlu1 %621 }
 0x1b3   : > { %3367 = vst [vmem:[#allocation24_spill] sm:$0xff] %v2525_v13  ;;  %v2542_v13 = vadd.f32 %v777_v55, %v2441_v32  ;;  %v2563_v55 = vadd.f32 %v774_v49, %v2443_v34 }
 0x1ba   : > { %1843 = vmatmul.msk.bf16.gmra.mxu2 %vm428_vm1, %v700_v0  ;;  %1859 = vmatmul.msk.bf16.gmra.mxu3 %vm428_vm1, %v700_v0  ;;  %v868_v0 = vpop.f32.mrf.mxu1 }
 0x1bd   : > { %v2423_v23 = vpop.f32.mrf.mxu2  ;;  %v2425_v24 = vpop.f32.mrf.mxu3 }
 0x1c5   : > { %v2427_v25 = vpop.f32.mrf.mxu2  ;;  %v2429_v26 = vpop.f32.mrf.mxu3 }
 0x1ca   : > { %1844 = vmatmul.msk.bf16.gmra.mxu2 %vm428_vm1, %v702_v7  ;;  %1860 = vmatmul.msk.bf16.gmra.mxu3 %vm428_vm1, %v702_v7  ;;  %v871_v7 = vpop.f32.mrf.mxu1 }
 0x1cd   : > { %v2433_v27 = vpop.f32.mrf.mxu2  ;;  %v2435_v28 = vpop.f32.mrf.mxu3 }
 0x1d2   : > { %v873_v15 = vpop.f32.mrf.mxu1 }
 0x1d5   : > { %v2437_v29 = vpop.f32.mrf.mxu2  ;;  %v2439_v31 = vpop.f32.mrf.mxu3 }
 0x1da   : > { %1845 = vmatmul.msk.bf16.gmra.mxu2 %vm428_vm1, %v704_v33  ;;  %1861 = vmatmul.msk.bf16.gmra.mxu3 %vm428_vm1, %v704_v33  ;;  %v876_v33 = vpop.f32.mrf.mxu1 }
 0x1dd   : > { %v2447_v35 = vpop.f32.mrf.mxu2  ;;  %v2449_v36 = vpop.f32.mrf.mxu3 }
 0x1e5   : > { %v2455_v39 = vpop.f32.mrf.mxu2  ;;  %v2457_v40 = vpop.f32.mrf.mxu3 }
 0x1ed   : > { %v2463_v43 = vpop.f32.mrf.mxu2  ;;  %v2465_v44 = vpop.f32.mrf.mxu3 }
 0x1f5   : > { %v2469_v46 = vpop.f32.mrf.mxu2  ;;  %v2471_v47 = vpop.f32.mrf.mxu3 }
 0x1fd   : > { %v2475_v51 = vpop.f32.mrf.mxu2  ;;  %v2477_v52 = vpop.f32.mrf.mxu3 }
 0x205   : > { %v2483_v57 = vpop.f32.mrf.mxu2  ;;  %v2485_v58 = vpop.f32.mrf.mxu3 }
 0x206   : > { %3355 = vst [vmem:[#allocation12_spill] sm:$0xff] %v2485_v58 }
 0x20d   : > { %v2491_v62 = vpop.f32.mrf.mxu2  ;;  %v2493_v63 = vpop.f32.mrf.mxu3 }
 0x20e   : > { %3356 = vst [vmem:[#allocation13_spill] sm:$0xff] %v2491_v62 }
 0x20f   : > { %3357 = vst [vmem:[#allocation14_spill] sm:$0xff] %v2493_v63 }
 0x215   : > { %v2499_v4 = vpop.f32.mrf.mxu2  ;;  %v2501_v5 = vpop.f32.mrf.mxu3 }
 0x216   : > { %3358 = vst [vmem:[#allocation15_spill] sm:$0xff] %v2499_v4  ;;  %v2533_v4 = vpop.permute.xlu1 %631 }
 0x217   : > { %3359 = vst [vmem:[#allocation16_spill] sm:$0xff] %v2501_v5  ;;  %v2531_v5 = vpop.permute.xlu2 %626 }
 0x218   : > { %3370 = vst [vmem:[#allocation27_spill] sm:$0xff] %v2533_v4  ;;  %v2552_v4 = vadd.f32 %v779_v61, %v2451_v37  ;;  %v942_v61 = vmax.f32 %v2390_v18, %v2542_v13 }
 0x21a   : > { %3375 = vst [vmem:[#allocation32_spill] sm:$0xff] %v2552_v4 }
 0x21d   : > { %v2505_v9 = vpop.f32.mrf.mxu2  ;;  %v2507_v10 = vpop.f32.mrf.mxu3 }
 0x21e   : > { %3360 = vst [vmem:[#allocation17_spill] sm:$0xff] %v2505_v9 }
 0x21f   : > { %3361 = vst [vmem:[#allocation18_spill] sm:$0xff] %v2507_v10  ;;  %v789_v10 = vpop.f32.mrf.mxu0  ;;  %v2539_v58 = vpop.permute.xlu2 %636 }
 0x220   : > { %3373 = vst [vmem:[#allocation30_spill] sm:$0xff] %v2539_v58  ;;  %v2560_v58 = vadd.f32 %v782_v6, %v2453_v38  ;;  %v943_v6 = vmax.f32 %v2563_v55, %v2552_v4 }
 0x225   : > { %v2511_v16 = vpop.f32.mrf.mxu2  ;;  %v2513_v17 = vpop.f32.mrf.mxu3 }
 0x226   : > { %3362 = vst [vmem:[#allocation19_spill] sm:$0xff] %v2511_v16 }
 0x227   : > { %3363 = vst [vmem:[#allocation20_spill] sm:$0xff] %v2513_v17  ;;  %v878_v17 = vpop.f32.mrf.mxu1 }
 0x22d   : > { %v2519_v30 = vpop.f32.mrf.mxu2  ;;  %v2521_v2 = vpop.f32.mrf.mxu3 }
 0x22e   : > { %3364 = vst [vmem:[#allocation21_spill] sm:$0xff] %v2519_v30  ;;  %v792_v30 = vpop.f32.mrf.mxu0 }
 0x22f   : > { %3365 = vst [vmem:[#allocation22_spill] sm:$0xff] %v2521_v2  ;;  %v881_v2 = vpop.f32.mrf.mxu1 }
 0x235   : > { %v2527_v9 = vpop.f32.mrf.mxu2  ;;  %v2529_v16 = vpop.f32.mrf.mxu3 }
 0x236   : > { %3368 = vst [vmem:[#allocation25_spill] sm:$0xff] %v2527_v9  ;;  %v794_v49 = vpop.f32.mrf.mxu0 }
 0x237   : > { %3369 = vst [vmem:[#allocation26_spill] sm:$0xff] %v2529_v16  ;;  %v2549_v16 = vadd.f32 %v866_v56, %v2441_v32  ;;  %v2569_v32 = vadd.f32 %v784_v12, %v2459_v41  ;;  %v2572_v56 = vadd.f32 %v863_v50, %v2443_v34  ;;  %v2590_v34 = vadd.f32 %v789_v10, %v2467_v45  ;;  %v883_v50 = vpop.f32.mrf.mxu1 }
 0x238   : > { %v944_v12 = vmax.f32 %v942_v61, %v2560_v58  ;;  %v2607_v10 = vadd.f32 %v794_v49, %v2479_v53 }
 0x23a   : > { %3377 = vst [vmem:[#allocation34_spill] sm:$0xff] %v2607_v10 }
 0x23d   : > { %v2535_v63 = vpop.f32.mrf.mxu2  ;;  %v2537_v62 = vpop.f32.mrf.mxu3 }
 0x23e   : > { %3371 = vst [vmem:[#allocation28_spill] sm:$0xff] %v2535_v63  ;;  %v2554_v63 = vpop.permute.xlu1 %641 }
 0x23f   : > { %3372 = vst [vmem:[#allocation29_spill] sm:$0xff] %v2537_v62  ;;  %v2557_v62 = vadd.f32 %v868_v0, %v2451_v37  ;;  %v2577_v37 = vadd.f32 %v873_v15, %v2459_v41  ;;  %v2580_v0 = vadd.f32 %v787_v22, %v2461_v42  ;;  %v2596_v15 = vadd.f32 %v878_v17, %v2467_v45 }
 0x240   : > { %v2599_v22 = vadd.f32 %v792_v30, %v2473_v48  ;;  %v2612_v45 = vadd.f32 %v883_v50, %v2479_v53  ;;  %v2630_v50 = vpop.permute.xlu2 %646 }
 0x241   : > { %3376 = vst [vmem:[#allocation33_spill] sm:$0xff] %v2557_v62  ;;  %v980_v41 = vmax.f32 %v2572_v56, %v2557_v62  ;;  %v946_v61 = vmax.f32 %v944_v12, %v2580_v0 }
 0x243   : > { %v982_v62 = vmax.f32 %v980_v41, %v2577_v37  ;;  %v948_v53 = vmax.f32 %v946_v61, %v2599_v22  ;;  %v577_v41 = vpop.permute.xlu0 %576 }
 0x244   : > { %v2649_v61 = vadd.f32 %v2435_v28, %v577_v41  ;;  %v2667_v28 = vadd.f32 %v2449_v36, %v2495_v1 }
 0x245   : > { %v2544_v14 = vpop.f32.mrf.mxu2  ;;  %v2546_v9 = vpop.f32.mrf.mxu3  ;;  %v984_v49 = vmax.f32 %v982_v62, %v2596_v15  ;;  %v2646_v62 = vadd.f32 %v2433_v27, %v577_v41  ;;  %v2663_v27 = vadd.f32 %v2447_v35, %v2495_v1  ;;  %v2681_v35 = vadd.f32 %v2457_v40, %v2497_v3 }
 0x246   : > { %3374 = vst [vmem:[#allocation31_spill] sm:$0xff] %v2544_v14  ;;  %v2566_v14 = vadd.f32 %v871_v7, %v2453_v38  ;;  %v979_v38 = vmax.f32 %v2392_v19, %v2549_v16  ;;  %v2587_v7 = vadd.f32 %v876_v33, %v2461_v42  ;;  %v945_v42 = vmax.f32 %v943_v6, %v2569_v32 }
 0x247   : > { %v2604_v33 = vadd.f32 %v881_v2, %v2473_v48  ;;  %v2622_v2 = vadd.f32 %v2423_v23, %v2481_v54  ;;  %v2626_v48 = vadd.f32 %v2425_v24, %v2481_v54  ;;  %v2640_v23 = vadd.f32 %v2429_v26, %v2487_v59  ;;  %v2642_v24 = vpop.permute.xlu1 %651  ;;  %3381 = vst [vmem:[#allocation36_spill] sm:$0xff] %v2681_v35 }
 0x248   : > { %v981_v4 = vmax.f32 %v979_v38, %v2566_v14  ;;  %v947_v6 = vmax.f32 %v945_v42, %v2590_v34  ;;  %v2636_v42 = vadd.f32 %v2427_v25, %v2487_v59  ;;  %v986_v54 = vmax.f32 %v984_v49, %v2612_v45 }
 0x249   : > { %v2659_v26 = vadd.f32 %v2439_v31, %v2489_v60  ;;  %v3378_v59 = vmov 0  ;;  %v2677_v31 = vadd.f32 %v2455_v39, %v2497_v3  ;;  %v2693_v39 = vadd.f32 %v2465_v44, %v2503_v8 }
 0x24a   : > { %v983_v38 = vmax.f32 %v981_v4, %v2587_v7  ;;  %v949_v4 = vmax.f32 %v947_v6, %v2607_v10  ;;  %v950_v6 = vmax.f32 %v948_v53, %v2622_v2  ;;  %v2655_v10 = vadd.f32 %v2437_v29, %v2489_v60 }
 0x24b   : > { %v988_v29 = vmax.f32 %v986_v54, %v2640_v23  ;;  %v2149_v60 = vmov -inf   ;;  %v2689_v53 = vadd.f32 %v2463_v43, %v2503_v8  ;;  %3383 = vst [vmem:[#allocation38_spill] sm:$0xff] %v2693_v39  ;;  %v3384_v40 = vmov 0.0  }
 0x24c   : > { %v985_v12 = vmax.f32 %v983_v38, %v2604_v33  ;;  %v473_v38 = vlaneseq  ;;  %v951_v49 = vmax.f32 %v949_v4, %v2636_v42  ;;  %v952_v36 = vmax.f32 %v950_v6, %v2646_v62 }
 0x24d   : > { %v2614_v17 = vpop.f32.mrf.mxu2  ;;  %v2616_v30 = vpop.f32.mrf.mxu3  ;;  %3382 = vst [vmem:[#allocation37_spill] sm:$0xff] %v2689_v53  ;;  %v990_v4 = vmax.f32 %v988_v29, %v2659_v26  ;;  %v2702_v54 = vadd.f32 %v2469_v46, %v2509_v11  ;;  %v2706_v43 = vadd.f32 %v2471_v47, %v2509_v11  ;;  %v2716_v6 = vadd.f32 %v2477_v52, %v2515_v20  ;;  %v3390_v11 = vld [vmem:[#allocation12_spill] sm:$0xff]  ;;  %v3393_v52 = vld [vmem:[#allocation13_spill] sm:$0xff] }
 0x24e   : > { %v987_v25 = vmax.f32 %v985_v12, %v2626_v48  ;;  %vm2669_vm2 = vcmp.lt.s32.totalorder %v473_v38, 256  ;;  %v953_v3 = vmax.f32 %v951_v49, %v2655_v10  ;;  %v954_v44 = vmax.f32 %v952_v36, %v2663_v27  ;;  %v657_v29 = vpop.permute.xlu2 %656  ;;  %v3392_v36 = vld [vmem:[#allocation23_spill] sm:$0xff] }
 0x24f   : > { %v3379_v59 = vsel %vm2669_vm2, 4294967295, %v3378_v59  ;;  %477 = vst.msk [vmem:[#allocation3] sm:$0x3] %vm2669_vm2, %v2149_v60  ;;  %v2712_v38 = vadd.f32 %v2475_v51, %v2515_v20  ;;  %v992_v46 = vmax.f32 %v990_v4, %v2681_v35  ;;  %v2722_v47 = vadd.f32 %v2483_v57, %v2517_v21 }
 0x250   : > { %3380 = vst [vmem:[#allocation35_spill] sm:$0xff] %v3379_v59  ;;  %v989_v1 = vmax.f32 %v987_v25, %v2649_v61  ;;  %v955_v25 = vmax.f32 %v953_v3, %v2677_v31  ;;  %v2726_v49 = vadd.f32 %v3390_v11, %v2517_v21  ;;  %v956_v51 = vmax.f32 %v954_v44, %v2689_v53  ;;  %v662_v3 = vpop.permute.xlu1 %661  ;;  %v3396_v21 = vld [vmem:[#allocation24_spill] sm:$0xff]  ;;  %v3397_v11 = vld [vmem:[#allocation15_spill] sm:$0xff] }
 0x251   : > { %478 = vst.msk [vmem:[#allocation4] sm:$0x3] %vm2669_vm2, %v3384_v40  ;;  %v2732_v20 = vadd.f32 %v3393_v52, %v3392_v36  ;;  %v994_v4 = vmax.f32 %v992_v46, %v2706_v43  ;;  %v2742_v35 = vadd.f32 %v3397_v11, %v3396_v21  ;;  %v3399_v44 = vld [vmem:[#allocation16_spill] sm:$0xff]  ;;  %v3405_v53 = vld [vmem:[#allocation19_spill] sm:$0xff] }
 0x252   : > { %3385 = vst [vmem:[#allocation39_spill] sm:$0xff] %v2702_v54  ;;  %v991_v8 = vmax.f32 %v989_v1, %v2667_v28  ;;  %v3394_v1 = vld [vmem:[#allocation14_spill] sm:$0xff]  ;;  %v957_v57 = vmax.f32 %v955_v25, %v2702_v54  ;;  %v958_v52 = vmax.f32 %v956_v51, %v2712_v38  ;;  %v3407_v51 = vld [vmem:[#allocation20_spill] sm:$0xff] }
 0x253   : > { %3386 = vst [vmem:[#allocation40_spill] sm:$0xff] %v2706_v43  ;;  %v2736_v40 = vadd.f32 %v3394_v1, %v3392_v36  ;;  %v3401_v36 = vld [vmem:[#allocation17_spill] sm:$0xff]  ;;  %v3402_v25 = vld [vmem:[#allocation18_spill] sm:$0xff]  ;;  %v996_v11 = vmax.f32 %v994_v4, %v2726_v49  ;;  %v3404_v43 = vld [vmem:[#allocation27_spill] sm:$0xff] }
 0x254   : > { %3387 = vst [vmem:[#allocation41_spill] sm:$0xff] %v2712_v38  ;;  %v993_v60 = vmax.f32 %v991_v8, %v2693_v39  ;;  %v2746_v8 = vadd.f32 %v3399_v44, %v3396_v21  ;;  %v2752_v1 = vadd.f32 %v3401_v36, %v2531_v5  ;;  %v2756_v54 = vadd.f32 %v3402_v25, %v2531_v5  ;;  %v3410_v38 = vld [vmem:[#allocation21_spill] sm:$0xff] }
 0x255   : > { %v844_v41 = vpop.f32.mrf.mxu2  ;;  %v933_v12 = vpop.f32.mrf.mxu3  ;;  %3388 = vst [vmem:[#allocation42_spill] sm:$0xff] %v2716_v6  ;;  %v959_v46 = vmax.f32 %v957_v57, %v2722_v47  ;;  %v2762_v21 = vadd.f32 %v3405_v53, %v3404_v43  ;;  %v2766_v44 = vadd.f32 %v3407_v51, %v3404_v43  ;;  %v3412_v57 = vld [vmem:[#allocation22_spill] sm:$0xff]  ;;  %v3414_v43 = vld [vmem:[#allocation25_spill] sm:$0xff] }
 0x256   : > { %3389 = vst [vmem:[#allocation43_spill] sm:$0xff] %v2722_v47  ;;  %v995_v39 = vmax.f32 %v993_v60, %v2716_v6  ;;  %v960_v60 = vmax.f32 %v958_v52, %v2732_v20  ;;  %v3409_v6 = vld [vmem:[#allocation30_spill] sm:$0xff]  ;;  %v998_v47 = vmax.f32 %v996_v11, %v2746_v8  ;;  %v2782_v51 = vadd.f32 %v3414_v43, %v2554_v63 }
 0x257   : > { %3391 = vst [vmem:[#allocation12_spill] sm:$0xff] %v2726_v49  ;;  %v2772_v5 = vadd.f32 %v3410_v38, %v3409_v6  ;;  %v2776_v25 = vadd.f32 %v3412_v57, %v3409_v6  ;;  %v961_v53 = vmax.f32 %v959_v46, %v2742_v35  ;;  %v3418_v6 = vld [vmem:[#allocation28_spill] sm:$0xff]  ;;  %v3420_v46 = vld [vmem:[#allocation29_spill] sm:$0xff] }
 0x258   : > { %3395 = vst [vmem:[#allocation23_spill] sm:$0xff] %v2736_v40  ;;  %v997_v36 = vmax.f32 %v995_v39, %v2736_v40  ;;  %v3416_v39 = vld [vmem:[#allocation26_spill] sm:$0xff]  ;;  %v962_v38 = vmax.f32 %v960_v60, %v2752_v1  ;;  %v2792_v57 = vadd.f32 %v3418_v6, %v2630_v50  ;;  %v1000_v43 = vmax.f32 %v998_v47, %v2766_v44 }
 0x259   : > { %3398 = vst [vmem:[#allocation13_spill] sm:$0xff] %v2742_v35  ;;  %v2786_v52 = vadd.f32 %v3416_v39, %v2554_v63  ;;  %v2796_v35 = vadd.f32 %v3420_v46, %v2630_v50  ;;  %v963_v11 = vmax.f32 %v961_v53, %v2762_v21  ;;  %v2806_v60 = vadd.f32 %v2546_v9, %v2642_v24 }
 0x25a   : > { %3400 = vst [vmem:[#allocation14_spill] sm:$0xff] %v2746_v8  ;;  %v999_v40 = vmax.f32 %v997_v36, %v2756_v54  ;;  %v3422_v8 = vld [vmem:[#allocation31_spill] sm:$0xff]  ;;  %v964_v36 = vmax.f32 %v962_v38, %v2772_v5  ;;  %v843_v6 = vadd.f32 %v2614_v17, %v657_v29  ;;  %v932_v50 = vadd.f32 %v2616_v30, %v657_v29 }
 0x25b   : > { %3403 = vst [vmem:[#allocation24_spill] sm:$0xff] %v2756_v54  ;;  %v2802_v63 = vadd.f32 %v3422_v8, %v2642_v24  ;;  %v965_v53 = vmax.f32 %v963_v11, %v2782_v51  ;;  %v1002_v47 = vmax.f32 %v1000_v43, %v2786_v52  ;;  %v845_v46 = vadd.f32 %v844_v41, %v662_v3  ;;  %v667_v8 = vpop.permute.xlu2 %666  ;;  %v672_v24 = vpop.permute.xlu1 %671 }
 0x25c   : > { %3406 = vst [vmem:[#allocation15_spill] sm:$0xff] %v2762_v21  ;;  %v1001_v39 = vmax.f32 %v999_v40, %v2776_v25  ;;  %v966_v21 = vmax.f32 %v964_v36, %v2792_v57 }
 0x25d   : > { %3408 = vst [vmem:[#allocation16_spill] sm:$0xff] %v2766_v44  ;;  %v847_v4 = vpop.f32.mrf.mxu2  ;;  %v936_v49 = vpop.f32.mrf.mxu3  ;;  %v934_v44 = vadd.f32 %v933_v12, %v662_v3  ;;  %v967_v38 = vmax.f32 %v965_v53, %v2802_v63  ;;  %v1004_v40 = vmax.f32 %v1002_v47, %v2806_v60 }
 0x25e   : > { %3411 = vst [vmem:[#allocation17_spill] sm:$0xff] %v2772_v5  ;;  %v1003_v9 = vmax.f32 %v1001_v39, %v2796_v35  ;;  %v937_v17 = vadd.f32 %v936_v49, %v667_v8  ;;  %v968_v5 = vmax.f32 %v966_v21, %v843_v6 }
 0x25f   : > { %3413 = vst [vmem:[#allocation18_spill] sm:$0xff] %v2776_v25  ;;  %v848_v25 = vadd.f32 %v847_v4, %v667_v8  ;;  %v1006_v43 = vmax.f32 %v1004_v40, %v934_v44 }
 0x260   : > { %3415 = vst [vmem:[#allocation27_spill] sm:$0xff] %v2782_v51  ;;  %v1005_v30 = vmax.f32 %v1003_v9, %v932_v50  ;;  %v969_v51 = vmax.f32 %v967_v38, %v845_v46 }
 0x261   : > { %3417 = vst [vmem:[#allocation19_spill] sm:$0xff] %v2786_v52  ;;  %v970_v3 = vmax.f32 %v968_v5, %v848_v25 }
 0x262   : > { %3419 = vst [vmem:[#allocation20_spill] sm:$0xff] %v2792_v57  ;;  %v1007_v52 = vmax.f32 %v1005_v30, %v937_v17 }
 0x263   : > { %3421 = vst [vmem:[#allocation30_spill] sm:$0xff] %v2796_v35 }
 0x264   : > { %3423 = vst [vmem:[#allocation21_spill] sm:$0xff] %v2802_v63 }
 0x265   : > { %3424 = vst [vmem:[#allocation22_spill] sm:$0xff] %v2806_v60  ;;  %v849_v29 = vpop.f32.mrf.mxu2  ;;  %v938_v11 = vpop.f32.mrf.mxu3  ;;  %v3450_v59 = vld [vmem:[#allocation17_spill] sm:$0xff] }
 0x266   : > { %v850_v41 = vadd.f32 %v849_v29, %v672_v24  ;;  %v939_v12 = vadd.f32 %v938_v11, %v672_v24  ;;  %v2818_v24 = vld [vmem:[#allocation3] sm:$0x3] }
 0x267   : > { %3425 = vst [vmem:[#allocation25_spill] sm:$0xff] %v2818_v24 }
 0x268   : > { %v971_v36 = vmax.f32 %v969_v51, %v850_v41  ;;  %v1008_v57 = vmax.f32 %v1006_v43, %v939_v12 }
 0x26a   : > { %v972_v39 = vmax.f32 %v970_v3, %v971_v36  ;;  %v1009_v35 = vmax.f32 %v1007_v52, %v1008_v57 }
 0x26c   : > { %v973_v54 = vrot.slane %v972_v39, 4  ;;  %v1010_v53 = vrot.slane %v1009_v35, 4 }
 0x26e   : > { %v974_v63 = vmax.f32 %v972_v39, %v973_v54  ;;  %v1011_v47 = vmax.f32 %v1009_v35, %v1010_v53 }
 0x270   : > { %v975_v4 = vrot.slane %v974_v63, 2  ;;  %v1012_v49 = vrot.slane %v1011_v47, 2 }
 0x272   : > { %v976_v21 = vmax.f32 %v974_v63, %v975_v4  ;;  %v1013_v8 = vmax.f32 %v1011_v47, %v1012_v49  ;;  %v3430_v49 = vld [vmem:[#allocation32_spill] sm:$0xff] }
 0x274   : > { %v977_v9 = vrot.slane %v976_v21, 1  ;;  %v1014_v60 = vrot.slane %v1013_v8, 1 }
 0x276   : > { %v1015_v38 = vmax.f32 %v1013_v8, %v1014_v60  ;;  %v978_v40 = vmax.f32 %v976_v21, %v977_v9 }
 0x278   : > { %v1018_v5 = vrot.slane %v1015_v38, 7 }
 0x27a   : > { %v1020_v51 = vsel %vm1019_vm3, %v978_v40, %v1018_v5 }
 0x27b   : > { %v2822_v52 = vmax.f32 %v2818_v24, %v1020_v51 }
 0x27d   : > { %3426 = vst [vmem:[#allocation26_spill] sm:$0xff] %v2822_v52  ;;  %v2827_v54 = vperm.slane %v2822_v52, 1  ;;  %v2835_v30 = vperm.slane %v2822_v52, 0 }
 0x27e   : > { %1581 = vst.msk [vmem:[#allocation3] sm:$0x3] %vm2669_vm2, %v2822_v52  ;;  %v3451_v52 = vld [vmem:[#allocation18_spill] sm:$0xff] }
 0x27f   : > { %v1092_v57 = vsub.f32 %v937_v17, %v2827_v54  ;;  %v1094_v63 = vsub.f32 %v939_v12, %v2827_v54  ;;  %v1087_v29 = vsub.f32 %v843_v6, %v2835_v30  ;;  %v1088_v11 = vsub.f32 %v932_v50, %v2827_v54 }
 0x280   : > { %v1089_v43 = vsub.f32 %v845_v46, %v2835_v30  ;;  %v1090_v3 = vsub.f32 %v934_v44, %v2827_v54  ;;  %v1091_v36 = vsub.f32 %v848_v25, %v2835_v30  ;;  %v1093_v39 = vsub.f32 %v850_v41, %v2835_v30 }
 0x281   : > { %v1126_v60 = vpack.c.bf16 %v1094_v63, %v1092_v57  ;;  %v1031_v6 = vsub.f32 %v2390_v18, %v2835_v30  ;;  %v1032_v50 = vsub.f32 %v2392_v19, %v2827_v54  ;;  %v1033_v44 = vsub.f32 %v2563_v55, %v2835_v30  ;;  %v3431_v18 = vld [vmem:[#allocation33_spill] sm:$0xff] }
 0x282   : > { %v2843_v53 = vpack.c.bf16 %v1089_v43, %v1087_v29  ;;  %v2845_v17 = vpack.c.bf16 %v1090_v3, %v1088_v11  ;;  %v2847_v12 = vpack.c.bf16 %v1093_v39, %v1091_v36  ;;  %v1034_v25 = vsub.f32 %v2572_v56, %v2827_v54  ;;  %v3440_v39 = vld [vmem:[#allocation43_spill] sm:$0xff] }
 0x283   : > { %v1188_v47 = vunpack.c.l.bf16 %v1126_v60  ;;  %v1190_v4 = vunpack.c.h.bf16 %v1126_v60  ;;  %v1035_v46 = vsub.f32 %v2542_v13, %v2835_v30  ;;  %v1036_v41 = vsub.f32 %v2549_v16, %v2827_v54 }
 0x284   : > { %3427 = vst [vmem:[#allocation28_spill] sm:$0xff] %v2843_v53  ;;  %v1037_v21 = vsub.f32 %v3430_v49, %v2835_v30  ;;  %v1038_v8 = vsub.f32 %v3431_v18, %v2827_v54  ;;  %v1039_v19 = vsub.f32 %v2560_v58, %v2835_v30  ;;  %v1040_v55 = vsub.f32 %v2566_v14, %v2827_v54 }
 0x285   : > { %3428 = vst [vmem:[#allocation29_spill] sm:$0xff] %v2845_v17  ;;  %v1313_v9 = vmul.f32 1.442695, %v1188_v47  ;;  %v1041_v56 = vsub.f32 %v2569_v32, %v2835_v30  ;;  %v1317_v13 = vmul.f32 1.442695, %v1190_v4  ;;  %v1042_v16 = vsub.f32 %v2577_v37, %v2827_v54  ;;  %v3432_v37 = vld [vmem:[#allocation34_spill] sm:$0xff] }
 0x286   : > { %3429 = vst [vmem:[#allocation31_spill] sm:$0xff] %v2847_v12  ;;  %v1043_v38 = vsub.f32 %v2580_v0, %v2835_v30  ;;  %v1044_v40 = vsub.f32 %v2587_v7, %v2827_v54  ;;  %v1045_v5 = vsub.f32 %v2590_v34, %v2835_v30  ;;  %v1046_v58 = vsub.f32 %v2596_v15, %v2827_v54  ;;  %v3441_v4 = vld [vmem:[#allocation12_spill] sm:$0xff] }
 0x287   : > { %v1047_v14 = vsub.f32 %v2599_v22, %v2835_v30  ;;  %v1048_v32 = vsub.f32 %v2604_v33, %v2827_v54  ;;  %v1049_v51 = vsub.f32 %v3432_v37, %v2835_v30  ;;  %v1050_v0 = vsub.f32 %v2612_v45, %v2827_v54  ;;  %v3443_v37 = vld [vmem:[#allocation13_spill] sm:$0xff] }
 0x288   : > { %v1051_v7 = vsub.f32 %v2622_v2, %v2835_v30  ;;  %v1052_v34 = vsub.f32 %v2626_v48, %v2827_v54  ;;  %1935 = vpow2.f32 %v1313_v9  ;;  %v1053_v15 = vsub.f32 %v2636_v42, %v2835_v30  ;;  %v3442_v9 = vld [vmem:[#allocation23_spill] sm:$0xff] }
 0x289   : > { %v1054_v22 = vsub.f32 %v2640_v23, %v2827_v54  ;;  %v1055_v33 = vsub.f32 %v2646_v62, %v2835_v30  ;;  %1937 = vpow2.f32 %v1317_v13  ;;  %v1056_v45 = vsub.f32 %v2649_v61, %v2827_v54  ;;  %v3433_v62 = vld [vmem:[#allocation36_spill] sm:$0xff]  ;;  %v3434_v61 = vld [vmem:[#allocation37_spill] sm:$0xff] }
 0x28a   : > { %v1057_v2 = vsub.f32 %v2655_v10, %v2835_v30  ;;  %v1058_v48 = vsub.f32 %v2659_v26, %v2827_v54  ;;  %v1059_v57 = vsub.f32 %v2663_v27, %v2835_v30  ;;  %v1060_v42 = vsub.f32 %v2667_v28, %v2827_v54  ;;  %v3435_v10 = vld [vmem:[#allocation38_spill] sm:$0xff]  ;;  %v3436_v26 = vld [vmem:[#allocation39_spill] sm:$0xff]  ;;  %v3437_v27 = vld [vmem:[#allocation40_spill] sm:$0xff] }
 0x28b   : > { %v1061_v23 = vsub.f32 %v2677_v31, %v2835_v30  ;;  %v1062_v63 = vsub.f32 %v3433_v62, %v2827_v54  ;;  %v1063_v60 = vsub.f32 %v3434_v61, %v2835_v30  ;;  %v1064_v29 = vsub.f32 %v3435_v10, %v2827_v54  ;;  %v3438_v28 = vld [vmem:[#allocation41_spill] sm:$0xff]  ;;  %v3439_v31 = vld [vmem:[#allocation42_spill] sm:$0xff] }
 0x28c   : > { %v1065_v11 = vsub.f32 %v3436_v26, %v2835_v30  ;;  %v1066_v43 = vsub.f32 %v3437_v27, %v2827_v54  ;;  %v1067_v3 = vsub.f32 %v3438_v28, %v2835_v30  ;;  %v1068_v36 = vsub.f32 %v3439_v31, %v2827_v54  ;;  %v3444_v61 = vld [vmem:[#allocation14_spill] sm:$0xff]  ;;  %v3446_v28 = vld [vmem:[#allocation24_spill] sm:$0xff] }
 0x28d   : > { %v1069_v47 = vsub.f32 %v3440_v39, %v2835_v30  ;;  %v1070_v49 = vsub.f32 %v3441_v4, %v2827_v54  ;;  %v1071_v18 = vsub.f32 %v2732_v20, %v2835_v30  ;;  %v1072_v13 = vsub.f32 %v3442_v9, %v2827_v54  ;;  %v3447_v39 = vld [vmem:[#allocation15_spill] sm:$0xff]  ;;  %v3449_v9 = vld [vmem:[#allocation16_spill] sm:$0xff] }
 0x28e   : > { %v1073_v62 = vsub.f32 %v3443_v37, %v2835_v30  ;;  %v1074_v10 = vsub.f32 %v3444_v61, %v2827_v54  ;;  %v2937_v26 = vpop.eup %1935  ;;  %v1075_v27 = vsub.f32 %v2752_v1, %v2835_v30  ;;  %v1076_v31 = vsub.f32 %v3446_v28, %v2827_v54  ;;  %v3452_v1 = vld [vmem:[#allocation27_spill] sm:$0xff] }
 0x28f   : > { %3445 = vst [vmem:[#allocation32_spill] sm:$0xff] %v2937_v26  ;;  %v1077_v20 = vsub.f32 %v3447_v39, %v2835_v30  ;;  %v1095_v4 = vpack.c.bf16 %v1033_v44, %v1031_v6  ;;  %v2945_v35 = vpop.eup %1937  ;;  %v1078_v37 = vsub.f32 %v3449_v9, %v2827_v54  ;;  %v1079_v61 = vsub.f32 %v3450_v59, %v2835_v30  ;;  %v3453_v28 = vld [vmem:[#allocation19_spill] sm:$0xff]  ;;  %v3454_v6 = vld [vmem:[#allocation20_spill] sm:$0xff]  ;;  %v3455_v39 = vld [vmem:[#allocation30_spill] sm:$0xff] }
 0x290   : > { %3448 = vst [vmem:[#allocation33_spill] sm:$0xff] %v2945_v35  ;;  %v1080_v24 = vsub.f32 %v3451_v52, %v2827_v54  ;;  %v1096_v26 = vpack.c.bf16 %v1034_v25, %v1032_v50  ;;  %v1081_v17 = vsub.f32 %v3452_v1, %v2835_v30  ;;  %v1082_v53 = vsub.f32 %v3453_v28, %v2827_v54  ;;  %v3456_v9 = vld [vmem:[#allocation21_spill] sm:$0xff]  ;;  %v3457_v59 = vld [vmem:[#allocation22_spill] sm:$0xff] }
 0x291   : > { %v1083_v44 = vsub.f32 %v3454_v6, %v2835_v30  ;;  %v1084_v35 = vsub.f32 %v3455_v39, %v2827_v54  ;;  %v1085_v12 = vsub.f32 %v3456_v9, %v2835_v30  ;;  %v1086_v52 = vsub.f32 %v3457_v59, %v2827_v54 }
 0x292   : > { %v1097_v25 = vpack.c.bf16 %v1037_v21, %v1035_v46  ;;  %v1109_v50 = vpack.c.bf16 %v1061_v23, %v1059_v57  ;;  %v2965_v1 = vpack.c.bf16 %v1038_v8, %v1036_v41  ;;  %v2967_v28 = vpack.c.bf16 %v1041_v56, %v1039_v19 }
 0x293   : > { %v2969_v6 = vpack.c.bf16 %v1042_v16, %v1040_v55  ;;  %v1127_v39 = vunpack.c.l.bf16 %v1095_v4  ;;  %v2971_v9 = vpack.c.bf16 %v1045_v5, %v1043_v38  ;;  %v2973_v30 = vpack.c.bf16 %v1046_v58, %v1044_v40 }
 0x294   : > { %v2975_v54 = vpack.c.bf16 %v1049_v51, %v1047_v14  ;;  %v1128_v59 = vunpack.c.l.bf16 %v1096_v26  ;;  %v2977_v21 = vpack.c.bf16 %v1050_v0, %v1048_v32  ;;  %v1105_v46 = vpack.c.bf16 %v1053_v15, %v1051_v7 }
 0x295   : > { %v1107_v23 = vpack.c.bf16 %v1057_v2, %v1055_v33  ;;  %v1129_v57 = vunpack.c.h.bf16 %v1095_v4  ;;  %v2979_v8 = vpack.c.bf16 %v1054_v22, %v1052_v34  ;;  %v2981_v41 = vpack.c.bf16 %v1058_v48, %v1056_v45 }
 0x296   : > { %v2983_v19 = vpack.c.bf16 %v1062_v63, %v1060_v42  ;;  %v1155_v55 = vunpack.c.l.bf16 %v1109_v50  ;;  %v2985_v56 = vpack.c.bf16 %v1065_v11, %v1063_v60  ;;  %v2987_v16 = vpack.c.bf16 %v1066_v43, %v1064_v29 }
 0x297   : > { %v1130_v38 = vunpack.c.h.bf16 %v1096_v26  ;;  %v1191_v40 = vmul.f32 1.442695, %v1127_v39  ;;  %v2989_v5 = vpack.c.bf16 %v1069_v47, %v1067_v3  ;;  %v2991_v58 = vpack.c.bf16 %v1070_v49, %v1068_v36 }
 0x298   : > { %v1157_v14 = vunpack.c.h.bf16 %v1109_v50  ;;  %v1193_v32 = vmul.f32 1.442695, %v1128_v59  ;;  %v2993_v51 = vpack.c.bf16 %v1073_v62, %v1071_v18  ;;  %v2995_v0 = vpack.c.bf16 %v1074_v10, %v1072_v13 }
 0x299   : > { %v1151_v7 = vunpack.c.l.bf16 %v1107_v23  ;;  %v1195_v34 = vmul.f32 1.442695, %v1129_v57  ;;  %v2997_v15 = vpack.c.bf16 %v1077_v20, %v1075_v27  ;;  %v2999_v22 = vpack.c.bf16 %v1078_v37, %v1076_v31 }
 0x29a   : > { %v1153_v33 = vunpack.c.h.bf16 %v1107_v23  ;;  %v1247_v45 = vmul.f32 1.442695, %v1155_v55  ;;  %v3001_v2 = vpack.c.bf16 %v1081_v17, %v1079_v61  ;;  %v1131_v48 = vunpack.c.l.bf16 %v1097_v25 }
 0x29b   : > { %1939 = vpow2.f32 %v1191_v40  ;;  %v1197_v42 = vmul.f32 1.442695, %v1130_v38  ;;  %v3003_v63 = vpack.c.bf16 %v1082_v53, %v1080_v24  ;;  %v1133_v60 = vunpack.c.h.bf16 %v1097_v25 }
 0x29c   : > { %1941 = vpow2.f32 %v1193_v32  ;;  %v1251_v29 = vmul.f32 1.442695, %v1157_v14  ;;  %v3005_v11 = vpack.c.bf16 %v1085_v12, %v1083_v44  ;;  %v1147_v43 = vunpack.c.l.bf16 %v1105_v46 }
 0x29d   : > { %1943 = vpow2.f32 %v1195_v34  ;;  %v1239_v3 = vmul.f32 1.442695, %v1151_v7  ;;  %v3007_v36 = vpack.c.bf16 %v1086_v52, %v1084_v35  ;;  %v1149_v47 = vunpack.c.h.bf16 %v1105_v46 }
 0x29e   : > { %v1243_v49 = vmul.f32 1.442695, %v1153_v33  ;;  %1945 = vpow2.f32 %v1247_v45  ;;  %v1132_v17 = vunpack.c.l.bf16 %v2965_v1  ;;  %v1135_v18 = vunpack.c.l.bf16 %v2967_v28 }
 0x29f   : > { %1947 = vpow2.f32 %v1197_v42  ;;  %v1199_v24 = vmul.f32 1.442695, %v1131_v48  ;;  %v1134_v53 = vunpack.c.h.bf16 %v2965_v1  ;;  %v1137_v13 = vunpack.c.h.bf16 %v2967_v28 }
 0x2a0   : > { %v1203_v12 = vmul.f32 1.442695, %v1133_v60  ;;  %1949 = vpow2.f32 %v1251_v29  ;;  %v1136_v10 = vunpack.c.l.bf16 %v2969_v6  ;;  %v1143_v35 = vunpack.c.l.bf16 %v2975_v54 }
 0x2a1   : > { %v1940_v62 = vpop.eup %1939  ;;  %v1231_v26 = vmul.f32 1.442695, %v1147_v43  ;;  %1951 = vpow2.f32 %v1239_v3  ;;  %v1138_v31 = vunpack.c.h.bf16 %v2969_v6  ;;  %v1145_v20 = vunpack.c.h.bf16 %v2975_v54 }
 0x2a2   : > { %v3015_v27 = vpop.eup %1941  ;;  %v1235_v4 = vmul.f32 1.442695, %v1149_v47  ;;  %1953 = vpow2.f32 %v1243_v49  ;;  %v1139_v61 = vunpack.c.l.bf16 %v2971_v9  ;;  %v1140_v44 = vunpack.c.l.bf16 %v2973_v30 }
 0x2a3   : > { %v1944_v37 = vpop.eup %1943  ;;  %1955 = vpow2.f32 %v1199_v24  ;;  %v1207_v52 = vmul.f32 1.442695, %v1135_v18  ;;  %v1141_v50 = vunpack.c.h.bf16 %v2971_v9  ;;  %v1142_v1 = vunpack.c.h.bf16 %v2973_v30 }
 0x2a4   : > { %v1946_v25 = vpop.eup %1945  ;;  %1957 = vpow2.f32 %v1203_v12  ;;  %v1211_v28 = vmul.f32 1.442695, %v1137_v13  ;;  %v1144_v6 = vunpack.c.l.bf16 %v2977_v21  ;;  %v1146_v54 = vunpack.c.h.bf16 %v2977_v21 }
 0x2a5   : > { %v3023_v39 = vpop.eup %1947  ;;  %v1223_v59 = vmul.f32 1.442695, %v1143_v35  ;;  %1959 = vpow2.f32 %v1231_v26  ;;  %v1148_v23 = vunpack.c.l.bf16 %v2979_v8  ;;  %v1150_v57 = vunpack.c.h.bf16 %v2979_v8 }
 0x2a6   : > { %v1950_v46 = vpop.eup %1949  ;;  %v1227_v55 = vmul.f32 1.442695, %v1145_v20  ;;  %1961 = vpow2.f32 %v1235_v4  ;;  %v1152_v30 = vunpack.c.l.bf16 %v2981_v41  ;;  %v1215_v38 = vmul.f32 1.442695, %v1139_v61 }
 0x2a7   : > { %v1952_v9 = vpop.eup %1951  ;;  %1963 = vpow2.f32 %v1207_v52  ;;  %v3030_v40 = vpack.c.bf16 %v1950_v46, %v1946_v25  ;;  %v1154_v32 = vunpack.c.h.bf16 %v2981_v41  ;;  %v1156_v21 = vunpack.c.l.bf16 %v2983_v19 }
 0x2a8   : > { %v1954_v14 = vpop.eup %1953  ;;  %1965 = vpow2.f32 %v1211_v28  ;;  %v1219_v7 = vmul.f32 1.442695, %v1141_v50  ;;  %v1158_v33 = vunpack.c.h.bf16 %v2983_v19  ;;  %v1159_v45 = vunpack.c.l.bf16 %v2985_v56 }
 0x2a9   : > { %v1956_v34 = vpop.eup %1955  ;;  %v1201_v48 = vmul.f32 1.442695, %v1132_v17  ;;  %1967 = vpow2.f32 %v1223_v59  ;;  %1520 = vmatpush.bf16.msra.mxu0 %v3030_v40  ;;  %v1160_v60 = vunpack.c.l.bf16 %v2987_v16  ;;  %v1161_v29 = vunpack.c.h.bf16 %v2985_v56 }
 0x2aa   : > { %v1958_v42 = vpop.eup %1957  ;;  %v1205_v43 = vmul.f32 1.442695, %v1134_v53  ;;  %1969 = vpow2.f32 %v1227_v55  ;;  %v1162_v47 = vunpack.c.h.bf16 %v2987_v16  ;;  %v1209_v49 = vmul.f32 1.442695, %v1136_v10 }
 0x2ab   : > { %v1960_v3 = vpop.eup %1959  ;;  %1971 = vpow2.f32 %v1215_v38  ;;  %v3040_v18 = vpack.c.bf16 %v1954_v14, %v1952_v9  ;;  %v1163_v17 = vunpack.c.l.bf16 %v2989_v5  ;;  %v1213_v13 = vmul.f32 1.442695, %v1138_v31 }
 0x2ac   : > { %v1962_v24 = vpop.eup %1961  ;;  %1973 = vpow2.f32 %v1219_v7  ;;  %v3043_v12 = vpack.c.bf16 %v1944_v37, %v1940_v62  ;;  %v1164_v26 = vunpack.c.l.bf16 %v2991_v58  ;;  %v1217_v53 = vmul.f32 1.442695, %v1140_v44 }
 0x2ad   : > { %v1964_v35 = vpop.eup %1963  ;;  %1975 = vpow2.f32 %v1201_v48  ;;  %1521 = vmatpush.bf16.msra.mxu0 %v3040_v18  ;;  %v3047_v20 = vpack.c.bf16 %v1958_v42, %v1956_v34  ;;  %v1165_v4 = vunpack.c.h.bf16 %v2989_v5  ;;  %v1221_v61 = vmul.f32 1.442695, %v1142_v1 }
 0x2ae   : > { %v1966_v10 = vpop.eup %1965  ;;  %1977 = vpow2.f32 %v1205_v43  ;;  %v1353_v52 = vunpack.c.l.bf16 %v3043_v12  ;;  %v1225_v62 = vmul.f32 1.442695, %v1144_v6  ;;  %v3051_v37 = vpack.c.bf16 %v1962_v24, %v1960_v3 }
 0x2af   : > { %v1968_v31 = vpop.eup %1967  ;;  %1979 = vpow2.f32 %v1209_v49  ;;  %v1355_v25 = vunpack.c.h.bf16 %v3043_v12  ;;  %v1166_v44 = vunpack.c.h.bf16 %v2991_v58  ;;  %v1229_v28 = vmul.f32 1.442695, %v1146_v54 }
 0x2b0   : > { %v1970_v50 = vpop.eup %1969  ;;  %1981 = vpow2.f32 %v1213_v13  ;;  %v1233_v59 = vmul.f32 1.442695, %v1148_v23  ;;  %v3056_v1 = vpack.c.bf16 %v1966_v10, %v1964_v35  ;;  %v1357_v55 = vunpack.c.l.bf16 %v3047_v20  ;;  %v3458_v35 = vld [vmem:[#allocation31_spill] sm:$0xff] }
 0x2b1   : > { %v1972_v46 = vpop.eup %1971  ;;  %1983 = vpow2.f32 %v1217_v53  ;;  %1522 = vmatpush.bf16.msra.mxu0 %v3051_v37  ;;  %v1417_v9 = vadd.f32 %v1355_v25, %v1353_v52  ;;  %v1167_v38 = vunpack.c.l.bf16 %v2993_v51  ;;  %v1237_v14 = vmul.f32 1.442695, %v1150_v57 }
 0x2b2   : > { %v1974_v6 = vpop.eup %1973  ;;  %1985 = vpow2.f32 %v1221_v61  ;;  %v1241_v7 = vmul.f32 1.442695, %v1152_v30  ;;  %v3064_v54 = vpack.c.bf16 %v1970_v50, %v1968_v31  ;;  %v1359_v23 = vunpack.c.h.bf16 %v3047_v20 }
 0x2b3   : > { %v3062_v34 = vpop.eup %1975  ;;  %1987 = vpow2.f32 %v1225_v62  ;;  %v1418_v48 = vadd.f32 %v1417_v9, %v1357_v55  ;;  %v1169_v43 = vunpack.c.h.bf16 %v2993_v51  ;;  %v1245_v3 = vmul.f32 1.442695, %v1154_v32  ;;  %v3459_v62 = vld [vmem:[#allocation28_spill] sm:$0xff] }
 0x2b4   : > { %v3067_v42 = vpop.eup %1977  ;;  %1989 = vpow2.f32 %v1229_v28  ;;  %v1249_v8 = vmul.f32 1.442695, %v1156_v21  ;;  %v1325_v30 = vpack.c.bf16 %v1974_v6, %v1972_v46  ;;  %v1361_v49 = vunpack.c.l.bf16 %v3056_v1 }
 0x2b5   : > { %v3074_v57 = vpop.eup %1979  ;;  %1991 = vpow2.f32 %v1233_v59  ;;  %1523 = vmatpush.bf16.msra.mxu0 %v3064_v54  ;;  %v1419_v24 = vadd.f32 %v1418_v48, %v1359_v23  ;;  %v1187_v53 = vunpack.c.l.bf16 %v3458_v35  ;;  %v1189_v10 = vunpack.c.h.bf16 %v3458_v35 }
 0x2b6   : > { %v3078_v13 = vpop.eup %1981  ;;  %1993 = vpow2.f32 %v1237_v14  ;;  %v1253_v41 = vmul.f32 1.442695, %v1158_v33  ;;  %v1255_v21 = vmul.f32 1.442695, %v1159_v45  ;;  %v1363_v61 = vunpack.c.h.bf16 %v3056_v1 }
 0x2b7   : > { %v3084_v32 = vpop.eup %1983  ;;  %1995 = vpow2.f32 %v1241_v7  ;;  %v1420_v52 = vadd.f32 %v1419_v24, %v1361_v49  ;;  %v1183_v25 = vunpack.c.l.bf16 %v3459_v62  ;;  %v1185_v50 = vunpack.c.h.bf16 %v3459_v62 }
 0x2b8   : > { %v3089_v31 = vpop.eup %1985  ;;  %1997 = vpow2.f32 %v1245_v3  ;;  %v1259_v19 = vmul.f32 1.442695, %v1161_v29  ;;  %v1263_v28 = vmul.f32 1.442695, %v1163_v17  ;;  %v1365_v45 = vunpack.c.l.bf16 %v1325_v30 }
 0x2b9   : > { %v3095_v33 = vpop.eup %1987  ;;  %1999 = vpow2.f32 %v1249_v8  ;;  %1524 = vmatpush.bf16.msra.mxu0 %v1325_v30  ;;  %v1421_v59 = vadd.f32 %v1420_v52, %v1363_v61  ;;  %v1171_v55 = vunpack.c.l.bf16 %v2997_v15  ;;  %v1173_v9 = vunpack.c.h.bf16 %v2997_v15 }
 0x2ba   : > { %v3099_v46 = vpop.eup %1989  ;;  %2001 = vpow2.f32 %v1253_v41  ;;  %v1311_v6 = vmul.f32 1.442695, %v1187_v53  ;;  %v1315_v56 = vmul.f32 1.442695, %v1189_v10  ;;  %v1367_v29 = vunpack.c.h.bf16 %v1325_v30 }
 0x2bb   : > { %v3103_v14 = vpop.eup %1991  ;;  %2003 = vpow2.f32 %v1255_v21  ;;  %v1422_v7 = vadd.f32 %v1421_v59, %v1365_v45  ;;  %v1179_v17 = vunpack.c.l.bf16 %v3005_v11  ;;  %v1181_v48 = vunpack.c.h.bf16 %v3005_v11 }
 0x2bc   : > { %v3105_v23 = vpop.eup %1993  ;;  %2005 = vpow2.f32 %v1259_v19  ;;  %v1303_v3 = vmul.f32 1.442695, %v1183_v25  ;;  %v1307_v15 = vmul.f32 1.442695, %v1185_v50  ;;  %v1369_v49 = vunpack.c.l.bf16 %v3064_v54 }
 0x2bd   : > { %v3109_v8 = vpop.eup %1995  ;;  %2007 = vpow2.f32 %v1263_v28  ;;  %1525 = vmatpush.bf16.msra.mxu0 %v3056_v1  ;;  %v1423_v24 = vadd.f32 %v1422_v7, %v1367_v29  ;;  %v1175_v30 = vunpack.c.l.bf16 %v3001_v2  ;;  %v1177_v53 = vunpack.c.h.bf16 %v3001_v2  ;;  %v3460_v29 = vld [vmem:[#allocation10_spill] sm:$0xff] }
 0x2be   : > { %v1998_v35 = vpop.eup %1997  ;;  %v1267_v10 = vmul.f32 1.442695, %v1165_v4  ;;  %2009 = vpow2.f32 %v1311_v6  ;;  %v1271_v41 = vmul.f32 1.442695, %v1167_v38  ;;  %v1371_v21 = vunpack.c.h.bf16 %v3064_v54 }
 0x2bf   : > { %v2000_v11 = vpop.eup %1999  ;;  %2011 = vpow2.f32 %v1315_v56  ;;  %v1424_v61 = vadd.f32 %v1423_v24, %v1369_v49  ;;  %v1275_v1 = vmul.f32 1.442695, %v1169_v43  ;;  %v1295_v62 = vmul.f32 1.442695, %v1179_v17 }
 0x2c0   : > { %v2002_v52 = vpop.eup %2001  ;;  %2013 = vpow2.f32 %v1303_v3  ;;  %v3122_v25 = vpack.c.bf16 %v3023_v39, %v3015_v27  ;;  %v1299_v5 = vmul.f32 1.442695, %v1181_v48  ;;  %v1373_v4 = vunpack.c.l.bf16 %v3051_v37 }
 0x2c1   : > { %v2004_v2 = vpop.eup %2003  ;;  %2015 = vpow2.f32 %v1307_v15  ;;  %1526 = vmatpush.bf16.msra.mxu0 %v3047_v20  ;;  %v1425_v51 = vadd.f32 %v1424_v61, %v1371_v21  ;;  %v1279_v54 = vmul.f32 1.442695, %v1171_v55  ;;  %v1287_v50 = vmul.f32 1.442695, %v1175_v30 }
 0x2c2   : > { %v2006_v38 = vpop.eup %2005  ;;  %2017 = vpow2.f32 %v1267_v10  ;;  %v1291_v19 = vmul.f32 1.442695, %v1177_v53  ;;  %v1375_v28 = vunpack.c.h.bf16 %v3051_v37  ;;  %v3129_v27 = vpack.c.bf16 %v3067_v42, %v3062_v34 }
 0x2c3   : > { %v2008_v43 = vpop.eup %2007  ;;  %2019 = vpow2.f32 %v1271_v41  ;;  %v1426_v45 = vadd.f32 %v1425_v51, %v1373_v4  ;;  %v3131_v59 = vpack.c.bf16 %v2002_v52, %v2000_v11  ;;  %v1354_v20 = vunpack.c.l.bf16 %v3122_v25 }
 0x2c4   : > { %v2010_v39 = vpop.eup %2009  ;;  %2021 = vpow2.f32 %v1295_v62  ;;  %v1356_v6 = vunpack.c.h.bf16 %v3122_v25  ;;  %v1377_v56 = vunpack.c.l.bf16 %v3040_v18  ;;  %v1516_v7 = vrot.slane %v3460_v29, 2 }
 0x2c5   : > { %v2012_v55 = vpop.eup %2011  ;;  %2023 = vpow2.f32 %v1299_v5  ;;  %1527 = vmatpush.bf16.msra.mxu0 %v3043_v12  ;;  %v1427_v37 = vadd.f32 %v1426_v45, %v1375_v28  ;;  %v1283_v34 = vmul.f32 1.442695, %v1173_v9  ;;  %v1379_v48 = vunpack.c.h.bf16 %v3040_v18 }
 0x2c6   : > { %v2014_v17 = vpop.eup %2013  ;;  %2025 = vpow2.f32 %v1275_v1  ;;  %v3138_v42 = vpack.c.bf16 %v2012_v55, %v2010_v39  ;;  %v3144_v49 = vpack.c.bf16 %v3078_v13, %v3074_v57  ;;  %v1358_v12 = vunpack.c.l.bf16 %v3129_v27 }
 0x2c7   : > { %v2016_v3 = vpop.eup %2015  ;;  %v1428_v15 = vadd.f32 %v1427_v37, %v1377_v56  ;;  %v1454_v24 = vadd.f32 %v1356_v6, %v1354_v20  ;;  %2027 = vpow2.f32 %v1287_v50  ;;  %v1381_v53 = vunpack.c.l.bf16 %v3030_v40 }
 0x2c8   : > { %v2018_v30 = vpop.eup %2017  ;;  %1533 = vmatpush.bf16.msra.mxu1 %v3138_v42  ;;  %v3149_v9 = vpack.c.bf16 %v2006_v38, %v2004_v2  ;;  %1528 = vmatmul.bf16.vlgmr.msra.gmra.mxu0 %v1516_v7  ;;  %v3154_v18 = vpack.c.bf16 %v1998_v35, %v3109_v8  ;;  %2029 = vpow2.f32 %v1291_v19  ;;  %v1360_v13 = vunpack.c.h.bf16 %v3129_v27 }
 0x2c9   : > { %1546 = vmatpush.bf16.msrb.mxu0 %v3131_v59  ;;  %v2020_v10 = vpop.eup %2019  ;;  %v1429_v57 = vadd.f32 %v1428_v15, %v1379_v48  ;;  %v1455_v11 = vadd.f32 %v1454_v24, %v1358_v12  ;;  %v1168_v21 = vunpack.c.l.bf16 %v2995_v0  ;;  %2031 = vpow2.f32 %v1279_v54  ;;  %v3461_v24 = vld [vmem:[#allocation29_spill] sm:$0xff] }
 0x2ca   : > { %v2022_v41 = vpop.eup %2021  ;;  %v1383_v61 = vunpack.c.h.bf16 %v3030_v40  ;;  %v3159_v52 = vpack.c.bf16 %v2016_v3, %v2014_v17  ;;  %v1326_v8 = vpack.c.bf16 %v3089_v31, %v3084_v32  ;;  %v1362_v35 = vunpack.c.l.bf16 %v3144_v49 }
 0x2cb   : > { %v2024_v1 = vpop.eup %2023  ;;  %v1430_v62 = vadd.f32 %v1429_v57, %v1381_v53  ;;  %v1456_v2 = vadd.f32 %v1455_v11, %v1360_v13  ;;  %v1257_v4 = vmul.f32 1.442695, %v1160_v60  ;;  %2033 = vpow2.f32 %v1283_v34 }
 0x2cc   : > { %v2026_v5 = vpop.eup %2025  ;;  %1534 = vmatpush.bf16.msra.mxu1 %v3159_v52  ;;  %v3168_v40 = vpack.c.bf16 %v2018_v30, %v2008_v43  ;;  %v3172_v51 = vpack.c.bf16 %v3105_v23, %v3103_v14  ;;  %v1385_v38 = vunpack.c.l.bf16 %v3149_v9  ;;  %v1364_v32 = vunpack.c.h.bf16 %v3144_v49 }
 0x2cd   : > { %1547 = vmatpush.bf16.msrb.mxu0 %v3154_v18  ;;  %v1431_v54 = vadd.f32 %v1430_v62, %v1383_v61  ;;  %v1457_v31 = vadd.f32 %v1456_v2, %v1362_v35  ;;  %v2028_v50 = vpop.eup %2027  ;;  %v1170_v19 = vunpack.c.h.bf16 %v2995_v0  ;;  %v1261_v60 = vmul.f32 1.442695, %v1162_v47 }
 0x2ce   : > { %v3179_v28 = vpack.c.bf16 %v2024_v1, %v2022_v41  ;;  %v1387_v43 = vunpack.c.h.bf16 %v3149_v9  ;;  %v2030_v14 = vpop.eup %2029  ;;  %v1328_v45 = vpack.c.bf16 %v3099_v46, %v3095_v33  ;;  %v1366_v39 = vunpack.c.l.bf16 %v1326_v8 }
 0x2cf   : > { %v1432_v23 = vadd.f32 %v1431_v54, %v1385_v38  ;;  %v1458_v20 = vadd.f32 %v1457_v31, %v1364_v32  ;;  %v2032_v6 = vpop.eup %2031  ;;  %v1172_v55 = vunpack.c.l.bf16 %v2999_v22  ;;  %2035 = vpow2.f32 %v1257_v4 }
 0x2d0   : > { %v1265_v16 = vmul.f32 1.442695, %v1164_v26  ;;  %1535 = vmatpush.bf16.msra.mxu1 %v3179_v28  ;;  %v1339_v0 = vpack.c.bf16 %v2026_v5, %v2020_v10  ;;  %v1389_v47 = vunpack.c.l.bf16 %v3168_v40  ;;  %v1368_v37 = vunpack.c.h.bf16 %v1326_v8 }
 0x2d1   : > { %1548 = vmatpush.bf16.msrb.mxu0 %v3172_v51  ;;  %v1433_v56 = vadd.f32 %v1432_v23, %v1387_v43  ;;  %v1459_v17 = vadd.f32 %v1458_v20, %v1366_v39  ;;  %v2034_v34 = vpop.eup %2033  ;;  %v1174_v33 = vunpack.c.h.bf16 %v2999_v22  ;;  %2037 = vpow2.f32 %v1261_v60 }
 0x2d2   : > { %v1269_v46 = vmul.f32 1.442695, %v1166_v44  ;;  %v3193_v48 = vpack.c.bf16 %v2030_v14, %v2028_v50  ;;  %v1391_v26 = vunpack.c.h.bf16 %v3168_v40  ;;  %v1370_v15 = vunpack.c.l.bf16 %v1328_v45 }
 0x2d3   : > { %v1434_v3 = vadd.f32 %v1433_v56, %v1389_v47  ;;  %v1460_v12 = vadd.f32 %v1459_v17, %v1368_v37  ;;  %v1184_v30 = vunpack.c.l.bf16 %v3461_v24  ;;  %2039 = vpow2.f32 %v1265_v16 }
 0x2d4   : > { %v1273_v53 = vmul.f32 1.442695, %v1168_v21  ;;  %1536 = vmatpush.bf16.msra.mxu1 %v3193_v48  ;;  %v1393_v10 = vunpack.c.l.bf16 %v1339_v0  ;;  %v1341_v22 = vpack.c.bf16 %v2034_v34, %v2032_v6  ;;  %v1372_v13 = vunpack.c.h.bf16 %v1328_v45 }
 0x2d5   : > { %1549 = vmatpush.bf16.msrb.mxu0 %v1328_v45  ;;  %v1435_v57 = vadd.f32 %v1434_v3, %v1391_v26  ;;  %v1461_v58 = vadd.f32 %v1460_v12, %v1370_v15  ;;  %v2036_v44 = vpop.eup %2035  ;;  %v1176_v11 = vunpack.c.l.bf16 %v3003_v63  ;;  %v1186_v41 = vunpack.c.h.bf16 %v3461_v24  ;;  %v3462_v24 = vld [vmem:[#allocation32_spill] sm:$0xff] }
 0x2d6   : > { %2041 = vpow2.f32 %v1269_v46  ;;  %v1277_v61 = vmul.f32 1.442695, %v1170_v19  ;;  %v1395_v1 = vunpack.c.h.bf16 %v1339_v0  ;;  %v1374_v35 = vunpack.c.l.bf16 %v3172_v51 }
 0x2d7   : > { %v1436_v62 = vadd.f32 %v1435_v57, %v1393_v10  ;;  %v1462_v21 = vadd.f32 %v1461_v58, %v1372_v13  ;;  %v2038_v2 = vpop.eup %2037  ;;  %v1180_v5 = vunpack.c.l.bf16 %v3007_v36  ;;  %2043 = vpow2.f32 %v1273_v53 }
 0x2d8   : > { %v1281_v4 = vmul.f32 1.442695, %v1172_v55  ;;  %v1305_v38 = vmul.f32 1.442695, %v1184_v30  ;;  %1537 = vmatpush.bf16.msra.mxu1 %v1341_v22  ;;  %v1397_v54 = vunpack.c.l.bf16 %v1341_v22  ;;  %v1376_v31 = vunpack.c.h.bf16 %v3172_v51  ;;  %v3463_v30 = vld [vmem:[#allocation33_spill] sm:$0xff] }
 0x2d9   : > { %1550 = vmatpush.bf16.msrb.mxu0 %v1326_v8  ;;  %v1437_v32 = vadd.f32 %v1436_v62, %v1395_v1  ;;  %v1463_v50 = vadd.f32 %v1462_v21, %v1374_v35  ;;  %v2040_v60 = vpop.eup %2039  ;;  %v1178_v8 = vunpack.c.h.bf16 %v3003_v63  ;;  %v1182_v19 = vunpack.c.h.bf16 %v3007_v36 }
 0x2da   : > { %2045 = vpow2.f32 %v1277_v61  ;;  %v1309_v43 = vmul.f32 1.442695, %v1186_v41  ;;  %v1399_v14 = vunpack.c.h.bf16 %v1341_v22  ;;  %v1378_v45 = vunpack.c.l.bf16 %v3154_v18 }
 0x2db   : > { %v1438_v23 = vadd.f32 %v1437_v32, %v1397_v54  ;;  %v1464_v39 = vadd.f32 %v1463_v50, %v1376_v31  ;;  %2047 = vpow2.f32 %v1281_v4  ;;  %v1285_v6 = vmul.f32 1.442695, %v1174_v33 }
 0x2dc   : > { %v2042_v20 = vpop.eup %2041  ;;  %v1297_v55 = vmul.f32 1.442695, %v1180_v5  ;;  %1538 = vmatpush.bf16.msra.mxu1 %v1339_v0  ;;  %v1380_v51 = vunpack.c.h.bf16 %v3154_v18  ;;  %2049 = vpow2.f32 %v1305_v38  ;;  %v1401_v63 = vunpack.c.l.bf16 %v3193_v48 }
 0x2dd   : > { %1551 = vmatpush.bf16.msrb.mxu0 %v3144_v49  ;;  %v1439_v36 = vadd.f32 %v1438_v23, %v1399_v14  ;;  %v1465_v16 = vadd.f32 %v1464_v39, %v1378_v45  ;;  %v2044_v47 = vpop.eup %2043  ;;  %v1301_v56 = vmul.f32 1.442695, %v1182_v19  ;;  %2051 = vpow2.f32 %v1309_v43 }
 0x2de   : > { %v1382_v49 = vunpack.c.l.bf16 %v3131_v59  ;;  %v1403_v37 = vunpack.c.h.bf16 %v3193_v48  ;;  %v3212_v34 = vpack.c.bf16 %v2038_v2, %v2036_v44  ;;  %2053 = vpow2.f32 %v1285_v6 }
 0x2df   : > { %v1440_v17 = vadd.f32 %v1439_v36, %v1401_v63  ;;  %v1466_v0 = vadd.f32 %v1465_v16, %v1380_v51  ;;  %v1289_v18 = vmul.f32 1.442695, %v1176_v11  ;;  %v1293_v46 = vmul.f32 1.442695, %v1178_v8 }
 0x2e0   : > { %v2046_v33 = vpop.eup %2045  ;;  %1539 = vmatpush.bf16.msra.mxu1 %v3168_v40  ;;  %v1384_v26 = vunpack.c.h.bf16 %v3131_v59  ;;  %2055 = vpow2.f32 %v1297_v55  ;;  %v1405_v3 = vunpack.c.l.bf16 %v3179_v28  ;;  %v1407_v48 = vunpack.c.h.bf16 %v3179_v28  ;;  %v3464_v59 = vld [vmem:[#allocation11_spill] sm:$0xff] }
 0x2e1   : > { %1552 = vmatpush.bf16.msrb.mxu0 %v3129_v27  ;;  %v1441_v15 = vadd.f32 %v1440_v17, %v1403_v37  ;;  %v1467_v12 = vadd.f32 %v1466_v0, %v1382_v49  ;;  %v2048_v27 = vpop.eup %2047  ;;  %2057 = vpow2.f32 %v1301_v56  ;;  %v3220_v53 = vpack.c.bf16 %v3463_v30, %v3462_v24  ;;  %v3465_v24 = vld [vmem:[#allocation25_spill] sm:$0xff]  ;;  %v3466_v30 = vld [vmem:[#allocation26_spill] sm:$0xff] }
 0x2e2   : > { %v3222_v10 = vpack.c.bf16 %v2042_v20, %v2040_v60  ;;  %v2050_v40 = vpop.eup %2049  ;;  %v1517_v57 = vrot.slane %v3464_v59, 2  ;;  %v1386_v13 = vunpack.c.l.bf16 %v3212_v34  ;;  %2059 = vpow2.f32 %v1289_v18 }
 0x2e3   : > { %v1442_v22 = vadd.f32 %v1441_v15, %v1405_v3  ;;  %v1468_v58 = vadd.f32 %v1467_v12, %v1384_v26  ;;  %v2052_v44 = vpop.eup %2051  ;;  %v1409_v28 = vunpack.c.l.bf16 %v3159_v52  ;;  %v1388_v41 = vunpack.c.h.bf16 %v3212_v34 }
 0x2e4   : > { %1540 = vmatpush.bf16.msra.mxu1 %v3149_v9  ;;  %2061 = vpow2.f32 %v1293_v46  ;;  %v1340_v1 = vpack.c.bf16 %v2046_v33, %v2044_v47  ;;  %v1390_v62 = vunpack.c.l.bf16 %v3222_v10  ;;  %v1411_v21 = vunpack.c.h.bf16 %v3159_v52 }
 0x2e5   : > { %1553 = vmatpush.bf16.msrb.mxu0 %v3122_v25  ;;  %v1443_v11 = vadd.f32 %v1442_v22, %v1407_v48  ;;  %v1469_v61 = vadd.f32 %v1468_v58, %v1386_v13  ;;  %v2054_v25 = vpop.eup %2053  ;;  %v1348_v2 = vpack.c.bf16 %v2052_v44, %v2050_v40  ;;  %v1413_v38 = vunpack.c.l.bf16 %v3138_v42 }
 0x2e6   : > { %v2056_v35 = vpop.eup %2055  ;;  %v1392_v29 = vunpack.c.h.bf16 %v3222_v10  ;;  %v1342_v31 = vpack.c.bf16 %v2054_v25, %v2048_v27  ;;  %v1394_v50 = vunpack.c.l.bf16 %v1340_v1  ;;  %v1415_v60 = vunpack.c.h.bf16 %v3138_v42  ;;  %v1351_v25 = vld [vmem:[#allocation4] sm:$0x3] }
 0x2e7   : > { %v1444_v9 = vadd.f32 %v1443_v11, %v1409_v28  ;;  %1541 = vmatmul.bf16.vlgmr.msra.gmra.mxu1 %v1517_v57  ;;  %v1470_v5 = vadd.f32 %v1469_v61, %v1388_v41  ;;  %v2058_v4 = vpop.eup %2057  ;;  %v1396_v23 = vunpack.c.h.bf16 %v1340_v1  ;;  %v1410_v17 = vunpack.c.l.bf16 %v1348_v2 }
 0x2e8   : > { %1559 = vmatpush.bf16.msrb.mxu1 %v3220_v53  ;;  %1554 = vmatmul.bf16.vlgmr.msrb.gmra.mxu0 %v1516_v7  ;;  %v2060_v32 = vpop.eup %2059  ;;  %v1346_v8 = vpack.c.bf16 %v2058_v4, %v2056_v35  ;;  %v1398_v20 = vunpack.c.l.bf16 %v1342_v31  ;;  %v1400_v55 = vunpack.c.h.bf16 %v1342_v31  ;;  %v1412_v18 = vunpack.c.h.bf16 %v1348_v2 }
 0x2e9   : > { %v1445_v54 = vadd.f32 %v1444_v9, %v1411_v21  ;;  %v1471_v7 = vadd.f32 %v1470_v5, %v1390_v62  ;;  %v1414_v26 = vunpack.c.l.bf16 %v3220_v53  ;;  %v1416_v12 = vunpack.c.h.bf16 %v3220_v53 }
 0x2ea   : > { %v2062_v43 = vpop.eup %2061  ;;  %v1406_v42 = vunpack.c.l.bf16 %v1346_v8  ;;  %v1408_v49 = vunpack.c.h.bf16 %v1346_v8  ;;  %v3467_v40 = vsub.f32 %v3465_v24, %v3466_v30 }
 0x2eb   : > { %v1446_v52 = vadd.f32 %v1445_v54, %v1413_v38  ;;  %v1472_v19 = vadd.f32 %v1471_v7, %v1392_v29  ;;  %v1344_v39 = vpack.c.bf16 %v2062_v43, %v2060_v32 }
 0x2ec   : > { %1560 = vmatpush.bf16.msrb.mxu1 %v1348_v2  ;;  %v1024_v22 = vmul.f32 1.442695, %v3467_v40 }
 0x2ed   : > { %v1447_v14 = vadd.f32 %v1446_v52, %v1415_v60  ;;  %v1473_v45 = vadd.f32 %v1472_v19, %v1394_v50  ;;  %v1402_v63 = vunpack.c.l.bf16 %v1344_v39  ;;  %v1404_v16 = vunpack.c.h.bf16 %v1344_v39  ;;  %v1510_v52 = vld.sshfl [vmem:[#allocation1] sm:$0xff pattern:$0x75316420] }
 0x2ee   : > { %2063 = vpow2.f32 %v1024_v22 }
 0x2ef   : > { %v1474_v6 = vadd.f32 %v1473_v45, %v1396_v23  ;;  %v1448_v33 = vrot.slane %v1447_v14, 4 }
 0x2f0   : > { %1561 = vmatpush.bf16.msrb.mxu1 %v1346_v8 }
 0x2f1   : > { %v1475_v51 = vadd.f32 %v1474_v6, %v1398_v20  ;;  %v1449_v15 = vadd.f32 %v1448_v33, %v1447_v14  ;;  %v1603_v33 = vld [vmem:[%s3304_s4] sm:$0x3] }
 0x2f3   : > { %v1476_v36 = vadd.f32 %v1475_v51, %v1400_v55  ;;  %v1450_v13 = vrot.slane %v1449_v15, 2 }
 0x2f4   : > { %1562 = vmatpush.bf16.msrb.mxu1 %v1344_v39  ;;  %v2064_v61 = vpop.eup %2063 }
 0x2f5   : > { %v1477_v47 = vadd.f32 %v1476_v36, %v1402_v63  ;;  %v1451_v44 = vadd.f32 %v1450_v13, %v1449_v15  ;;  %v1352_v59 = vmul.f32 %v2064_v61, %v1351_v25  ;;  %v1505_v32 = vperm.slane %v2064_v61, 1 }
 0x2f6   : > { %v1504_v50 = vperm.slane %v2064_v61, 0 }
 0x2f7   : > { %v1478_v56 = vadd.f32 %v1477_v47, %v1404_v16  ;;  %v1452_v41 = vrot.slane %v1451_v44, 1 }
 0x2f8   : > { %1563 = vmatpush.bf16.msrb.mxu1 %v1342_v31  ;;  %v1511_v31 = vld.sshfl [vmem:[#allocation1 + $0x8] sm:$0xff pattern:$0x75316420]  ;;  %v1514_v23 = vmul.f32 %v1510_v52, %v1504_v50 }
 0x2f9   : > { %v1479_v37 = vadd.f32 %v1478_v56, %v1406_v42  ;;  %v1515_v43 = vmul.f32 %v1511_v31, %v1505_v32 }
 0x2fb   : > { %v1480_v0 = vadd.f32 %v1479_v37, %v1408_v49  ;;  %v3469_v37 = vld [vmem:[#allocation9_spill] sm:$0xff] }
 0x2fc   : > { %1564 = vmatpush.bf16.msrb.mxu1 %v1340_v1  ;;  %v1453_v1 = vadd.f32 %v1452_v41, %v1451_v44 }
 0x2fd   : > { %v1481_v46 = vadd.f32 %v1480_v0, %v1410_v17 }
 0x2ff   : > { %v1482_v3 = vadd.f32 %v1481_v46, %v1412_v18  ;;  %v1608_v18 = vpop.permute.xlu2 %1607 }
 0x300   : > { %1565 = vmatpush.bf16.msrb.mxu1 %v3222_v10 }
 0x301   : > { %v1483_v27 = vadd.f32 %v1482_v3, %v1414_v26 }
 0x303   : > { %v1484_v48 = vadd.f32 %v1483_v27, %v1416_v12 }
 0x304   : > { %1566 = vmatpush.bf16.msrb.mxu1 %v3212_v34 }
 0x305   : > { %v1485_v10 = vrot.slane %v1484_v48, 4 }
 0x307   : > { %1567 = vmatmul.bf16.vlgmr.msrb.gmra.mxu1 %v1517_v57  ;;  %v1486_v58 = vadd.f32 %v1485_v10, %v1484_v48 }
 0x309   : > { %v1487_v28 = vrot.slane %v1486_v58, 2 }
 0x30b   : > { %v1488_v11 = vadd.f32 %v1487_v28, %v1486_v58 }
 0x30d   : > { %v1489_v53 = vrot.slane %v1488_v11, 1 }
 0x30f   : > { %v1490_v34 = vadd.f32 %v1489_v53, %v1488_v11 }
 0x311   : > { %v1493_v62 = vrot.slane %v1490_v34, 7 }
 0x313   : > { %v1494_v57 = vsel %vm1019_vm3, %v1453_v1, %v1493_v62 }
 0x314   : > { %v1496_v35 = vadd.f32 %v1494_v57, %v1352_v59 }
 0x316   : > { %1501 = vst.msk [vmem:[#allocation4] sm:$0x3] %vm2669_vm2, %v1496_v35 }
 0x31d   : > { %v1585_v29 = vld [vmem:[#allocation4] sm:$0x3] }
 0x31e   : > { %2065 = vrcp.f32 %v1585_v29 }
 0x324   : > { %v2066_v7 = vpop.eup %2065 }
 0x325   : > { %v1590_v60 = vperm.slane %v2066_v7, 1  ;;  %v1589_v55 = vperm.slane %v2066_v7, 0 }
 0x327   : > { %v1591_v39 = vrot.slane %v1590_v60, 4 }
 0x329   : > { %v1592_v63 = vsel %vm1577_vm4, %v1589_v55, %v1591_v39 }
 0x345   : > { %v1529_v9 = vpop.f32.mrf.mxu0 }
 0x34d   : > { %v1531_v2 = vpop.f32.mrf.mxu0 }
 0x364   : > { %v1542_v4 = vpop.f32.mrf.mxu1 }
 0x365   : > { %v1555_v5 = vpop.f32.mrf.mxu0  ;;  %v1543_v19 = vadd.f32 %v1542_v4, %v1529_v9 }
 0x367   : > { %v1572_v20 = vadd.f32 %v1543_v19, %v1514_v23 }
 0x36c   : > { %v1544_v54 = vpop.f32.mrf.mxu1 }
 0x36d   : > { %v1557_v38 = vpop.f32.mrf.mxu0 }
 0x384   : > { %v1568_v8 = vpop.f32.mrf.mxu1 }
 0x385   : > { %v1569_v14 = vadd.f32 %v1568_v8, %v1555_v5 }
 0x387   : > { %v1573_v45 = vadd.f32 %v1569_v14, %v1515_v43 }
 0x389   : > { %v1576_v6 = vrot.slane %v1573_v45, 4 }
 0x38b   : > { %v1578_v51 = vsel %vm1577_vm4, %v1572_v20, %v1576_v6 }
 0x38c   : > { %v1594_v36 = vmul.f32 %v1592_v63, %v1578_v51  ;;  %v1570_v16 = vpop.f32.mrf.mxu1 }
 0x38e   : > { %1596 = vst [vmem:[#allocation1] ss:$2 sm:$0xff] %v1594_v36 }
 0x395   : > { %v1597_v47 = vld.sshfl [vmem:[#allocation1] sm:$0xff pattern:$0x75316420]  ;;  %v1598_v42 = vld.sshfl [vmem:[#allocation1 + $0x8] sm:$0xff pattern:$0x75316420] }
 0x396   : > { %v1601_v56 = vpack.c.bf16 %v1597_v47, %v1597_v47  ;;  %v1602_v49 = vpack.c.bf16 %v1598_v42, %v1598_v42  ;;  %1647 = vst [vmem:[#allocation1] ss:$2 sm:$0xff] %v3469_v37 }
 0x398   : > { %v1614_v17 = vsel %vm432_vm0, %v1601_v56, 0  ;;  %v1617_v0 = vsel %vm432_vm0, %v1602_v49, 0 }
 0x399   : > { %1626 = vmatpush.bf16.msra.mxu0 %v1614_v17  ;;  %1639 = vmatpush.bf16.msra.mxu1 %v1617_v0 }
 0x39c   : > { %1862 = vmatmul.msk.bf16.vlgmr.msra.gmra.mxu0 %vm428_vm1, %v1603_v33  ;;  %1863 = vmatmul.msk.bf16.vlgmr.msra.gmra.mxu1 %vm428_vm1, %v1603_v33 }
 0x39d   : > { %v1649_v3 = vld.sshfl [vmem:[#allocation1 + $0x8] sm:$0xff pattern:$0x75316420]  ;;  %v1648_v27 = vld.sshfl [vmem:[#allocation1] sm:$0xff pattern:$0x75316420] }
 0x419   : > { %v1628_v46 = vpop.f32.mrf.mxu0  ;;  %v1641_v26 = vpop.f32.mrf.mxu1 }
 0x41a   : > { %v1629_v15 = vadd.f32 %v1628_v46, %v1608_v18  ;;  %v1642_v12 = vadd.f32 %v1641_v26, %v1608_v18 }
 0x41c   : > { %v1653_v48 = vadd.f32 %v1649_v3, %v1642_v12  ;;  %v1652_v24 = vadd.f32 %v1648_v27, %v1629_v15 }
 0x41e   : > { %v1656_v30 = vrot.slane %v1653_v48, 4 }
 0x420   : > { %v1657_v40 = vsel %vm1577_vm4, %v1652_v24, %v1656_v30 }
 0x421   : > { %v1643_v22 = vpop.f32.mrf.mxu1  ;;  %v1630_v13 = vpop.f32.mrf.mxu0  ;;  %1659 = vst [vmem:[%s371_s12] sm:$0xff] %v1657_v40 }
 0x422   : > { %2094 = shalt.err (!%p2091_p5)
}
 0x423   : > { %1874 = dma.vmem_to_hbm [thread:$0]  (%p2230_p4), %s1677_s15, 128, %s1679_s16, %s1661_s27  }
 0x424 PF: > { %p1880_p6 = scmp.ge.s32.totalorder %s2145_s29, 2  ;;  %s1690_s21 = sand.u32 1, %s2125_s24  }
 0x425   : > { %s1691_s8 = scalar_lea.sflag [#allocation7], %s1690_s21 }
 0x426   : > { %p1877_p7 = pnand %p1880_p6, %p2237_p8 }
 0x428   : > { %p1878_p9 = pneg %p1877_p7 }
 0x42a   : > { %2120 = dma.done.wait (%p1878_p9), %s1691_s8, 128  }
 0x42b   : > { %2122 = vsyncadd (%p1878_p9), %s1691_s8, 4294967168  ;;  %s20_s29 = sadd.s32 1, %s2145_s29   ;;  %s3470_s24 = smov %s2129_s25 }
 0x42c   : > { %p17_p10 = scmp.ge.s32.totalorder %s20_s29, 4   ;;  %s3471_s25 = smov %s2133_s26 }
 0x42d   : > { %s3472_s26 = smov %s2243_s14  ;;  %s3473_s27 = smov %s2141_s28 }
 0x42e   : > { %s3474_s28 = smov %s3476_s9  ;;  %19 = sbr.rel (!%p17_p10) target bundleno = 4 (0x4), region = 103 }
 0x433   :  { %1697 = vsyncpa [#allocation7], 1 }
 0x434   :  { %1699 = vsyncpa [#allocation7 + $0x1], 1 }

</bundles_post_ra>
